<compile_context>
chip_gen: v7x
topology: tpu7x:2x2x1
jax: 0.10.0
libtpu: 0.0.40
codegen_flags: <defaults>
</compile_context>

<pallas_src>
import jax
import jax.numpy as jnp
from jax.experimental import pallas as pl
from jax.experimental.pallas import tpu as pltpu


def _ae_kernel(x_ref, w1t_ref, w1_ref, b1_ref, b2_ref, o_ref):
    x = x_ref[...]            # (TB, dim_x)      bf16
    w1t = w1t_ref[...]        # (dim_x, n_hidden) bf16   (encoder weight, pre-transposed)
    w1 = w1_ref[...]          # (n_hidden, dim_x) bf16   (decoder weight, tied)
    b1 = b1_ref[...]          # (1, n_hidden)     f32
    b2 = b2_ref[...]          # (1, dim_x)        f32

    # encoder: x @ W1^T expressed as x @ w1_t -> standard matmul, K (dim_x) on RHS axis 0.
    h = jnp.dot(x, w1t, preferred_element_type=jnp.float32) + b1     # (TB, n_hidden) f32
    h = jnp.maximum(h, 0.0)                                          # ReLU in f32 (VPU)

    # decoder (tied weights): h @ W1 -> K (n_hidden) on RHS axis 0.
    y = jnp.dot(h.astype(w1.dtype), w1,
                preferred_element_type=jnp.float32) + b2             # (TB, dim_x) f32

    o_ref[...] = jax.nn.sigmoid(y)                                   # sigmoid in f32 (EUP)


def autoencoder_usps_forward(x, w1, b1, b2, *, block_b=128,
                             matmul_dtype=jnp.bfloat16):
    """x: (B, dim_x); w1: (n_hidden, dim_x); b1: (n_hidden,); b2: (dim_x,). Returns (B, dim_x) f32."""
    B, dim_x = x.shape
    n_hidden = w1.shape[0]

    # Pad batch to a multiple of block_b so every grid step sees a full tile.
    num_tiles = pl.cdiv(B, block_b)
    Bp = num_tiles * block_b
    x_p = x.astype(matmul_dtype)
    if Bp != B:
        x_p = jnp.pad(x_p, ((0, Bp - B), (0, 0)))

    w1_mx = w1.astype(matmul_dtype)          # (n_hidden, dim_x)  decoder operand
    w1t_mx = w1_mx.T                          # (dim_x, n_hidden)  encoder operand (pre-transposed)
    b1_2d = b1.reshape(1, n_hidden).astype(jnp.float32)
    b2_2d = b2.reshape(1, dim_x).astype(jnp.float32)

    # Note: dim_x=784 is not a multiple of 128, so output rows end in a masked store;
    # lane-padding 784->896 was judged a secondary win and is skipped for simplicity.
    out = pl.pallas_call(
        _ae_kernel,
        out_shape=jax.ShapeDtypeStruct((Bp, dim_x), jnp.float32),
        grid_spec=pltpu.PrefetchScalarGridSpec(
            num_scalar_prefetch=0,
            grid=(num_tiles,),
            in_specs=[
                pl.BlockSpec((block_b, dim_x), lambda i: (i, 0)),     # x tile streams
                pl.BlockSpec((dim_x, n_hidden), lambda i: (0, 0)),    # w1_t resident
                pl.BlockSpec((n_hidden, dim_x), lambda i: (0, 0)),    # w1   resident
                pl.BlockSpec((1, n_hidden), lambda i: (0, 0)),        # b1   resident
                pl.BlockSpec((1, dim_x), lambda i: (0, 0)),           # b2   resident
            ],
            out_specs=pl.BlockSpec((block_b, dim_x), lambda i: (i, 0)),
        ),
        compiler_params=pltpu.CompilerParams(
            dimension_semantics=("parallel",),   # batch tiles are independent -> v7x 2-TC split
        ),
    )(x_p, w1t_mx, w1_mx, b1_2d, b2_2d)

    return out[:B] if Bp != B else out


def _reference_forward(x, w1, b1, b2):
    h = jnp.maximum(x @ w1.T + b1, 0.0)
    return jax.nn.sigmoid(h @ w1 + b2)


if __name__ == "__main__":
    n_hidden = 20
    dim_x = 28 * 28
    batch = 256          # fills the MXU M dim; 2 grid tiles of 128 exercise the pipeline

    key = jax.random.PRNGKey(0)
    k_x, k_w1, k_b1, k_b2 = jax.random.split(key, 4)

    # Deterministic parameter init (PyTorch-style uniform(-1/sqrt(fan_in), 1/sqrt(fan_in))).
    bound1 = 1.0 / jnp.sqrt(dim_x)
    bound2 = 1.0 / jnp.sqrt(n_hidden)
    w1 = jax.random.uniform(k_w1, (n_hidden, dim_x), jnp.float32, -bound1, bound1)
    b1 = jax.random.uniform(k_b1, (n_hidden,), jnp.float32, -bound1, bound1)
    b2 = jax.random.uniform(k_b2, (dim_x,), jnp.float32, -bound2, bound2)

    x = jax.random.uniform(k_x, (batch, dim_x), jnp.float32)  # USPS/MNIST-like pixels in [0,1)

    out = autoencoder_usps_forward(x, w1, b1, b2)
    out = jax.block_until_ready(out)

    ref = _reference_forward(x, w1, b1, b2)
    assert out.shape == (batch, dim_x)
    # bf16 MXU operands vs f32 reference: sigmoid-squashed outputs agree to ~1e-3; 2e-2 is safe.
    assert jnp.allclose(out, ref, atol=2e-2, rtol=2e-2), "Pallas output mismatch vs reference"

    print("KERNEL_OK")
</pallas_src>

<mosaic_0001>
module attributes {stable_mosaic.version = 11 : i64} {
  func.func @_ae_kernel(%arg0: i32, %arg1: memref<128x784xbf16, #tpu.memory_space<vmem>>, %arg2: memref<784x20xbf16, #tpu.memory_space<vmem>>, %arg3: memref<20x784xbf16, #tpu.memory_space<vmem>>, %arg4: memref<1x20xf32, #tpu.memory_space<vmem>>, %arg5: memref<1x784xf32, #tpu.memory_space<vmem>>, %arg6: memref<128x784xf32, #tpu.memory_space<vmem>>) attributes {dimension_semantics = [#tpu.dimension_semantics<parallel>], iteration_bounds = array<i64: 2>, scalar_prefetch = 0 : i64, scratch_operands = 0 : i64, tpu.core_type = #tpu.core_type<tc>, window_params = [{transform_indices = @transform_0, window_bounds = array<i64: 128, 784>}, {pipeline_mode = #tpu.pipeline_mode<synchronous>, transform_indices = @transform_1, window_bounds = array<i64: 784, 20>}, {pipeline_mode = #tpu.pipeline_mode<synchronous>, transform_indices = @transform_2, window_bounds = array<i64: 20, 784>}, {pipeline_mode = #tpu.pipeline_mode<synchronous>, transform_indices = @transform_3, window_bounds = array<i64: 1, 20>}, {pipeline_mode = #tpu.pipeline_mode<synchronous>, transform_indices = @transform_4, window_bounds = array<i64: 1, 784>}, {transform_indices = @transform_5, window_bounds = array<i64: 128, 784>}]} {
    %c0 = arith.constant 0 : index
    %c0_0 = arith.constant 0 : index
    %0 = vector.load %arg1[%c0, %c0_0] : memref<128x784xbf16, #tpu.memory_space<vmem>>, vector<128x784xbf16>
    %c0_1 = arith.constant 0 : index
    %c0_2 = arith.constant 0 : index
    %1 = vector.load %arg2[%c0_1, %c0_2] : memref<784x20xbf16, #tpu.memory_space<vmem>>, vector<784x20xbf16>
    %c0_3 = arith.constant 0 : index
    %c0_4 = arith.constant 0 : index
    %2 = vector.load %arg3[%c0_3, %c0_4] : memref<20x784xbf16, #tpu.memory_space<vmem>>, vector<20x784xbf16>
    %c0_5 = arith.constant 0 : index
    %c0_6 = arith.constant 0 : index
    %3 = vector.load %arg4[%c0_5, %c0_6] : memref<1x20xf32, #tpu.memory_space<vmem>>, vector<1x20xf32>
    %c0_7 = arith.constant 0 : index
    %c0_8 = arith.constant 0 : index
    %4 = vector.load %arg5[%c0_7, %c0_8] : memref<1x784xf32, #tpu.memory_space<vmem>>, vector<1x784xf32>
    %cst = arith.constant dense<0.000000e+00> : vector<128x20xf32>
    %5 = tpu.matmul %0, %1, %cst {dimension_numbers = #tpu.dot_dimension_numbers<[1], [0], [0], [1], [0, 0, 1, 1], [], []>} : vector<128x784xbf16>, vector<784x20xbf16>, vector<128x20xf32> -> vector<128x20xf32>
    %6 = vector.broadcast %3 : vector<1x20xf32> to vector<128x20xf32>
    %7 = arith.addf %5, %6 : vector<128x20xf32>
    %cst_9 = arith.constant 0.000000e+00 : f32
    %8 = vector.broadcast %cst_9 : f32 to vector<128x20xf32>
    %9 = arith.maximumf %7, %8 : vector<128x20xf32>
    %10 = arith.truncf %9 : vector<128x20xf32> to vector<128x20xbf16>
    %cst_10 = arith.constant dense<0.000000e+00> : vector<128x784xf32>
    %11 = tpu.matmul %10, %2, %cst_10 {dimension_numbers = #tpu.dot_dimension_numbers<[1], [0], [0], [1], [0, 0, 1, 1], [], []>} : vector<128x20xbf16>, vector<20x784xbf16>, vector<128x784xf32> -> vector<128x784xf32>
    %12 = vector.broadcast %4 : vector<1x784xf32> to vector<128x784xf32>
    %13 = arith.addf %11, %12 : vector<128x784xf32>
    %14 = arith.negf %13 : vector<128x784xf32>
    %15 = math.exp %14 : vector<128x784xf32>
    %cst_11 = arith.constant 1.000000e+00 : f32
    %16 = vector.broadcast %cst_11 : f32 to vector<128x784xf32>
    %17 = arith.addf %16, %15 : vector<128x784xf32>
    %18 = arith.divf %16, %17 : vector<128x784xf32>
    %c0_12 = arith.constant 0 : index
    %c0_13 = arith.constant 0 : index
    %19 = vector.load %arg6[%c0_12, %c0_13] : memref<128x784xf32, #tpu.memory_space<vmem>>, vector<128x784xf32>
    tpu.vector_store %arg6[%c0_12, %c0_13], %18 {strides = array<i32>} : memref<128x784xf32, #tpu.memory_space<vmem>>, vector<128x784xf32>,
    return
  }
  func.func @transform_0(%arg0: i32) -> (i32, i32) {
    %c0_i32 = arith.constant 0 : i32
    %c0_i32_0 = arith.constant 0 : i32
    return %arg0, %c0_i32 : i32, i32
  }
  func.func @transform_1(%arg0: i32) -> (i32, i32) {
    %c0_i32 = arith.constant 0 : i32
    %c0_i32_0 = arith.constant 0 : i32
    %c0_i32_1 = arith.constant 0 : i32
    return %c0_i32, %c0_i32_0 : i32, i32
  }
  func.func @transform_2(%arg0: i32) -> (i32, i32) {
    %c0_i32 = arith.constant 0 : i32
    %c0_i32_0 = arith.constant 0 : i32
    %c0_i32_1 = arith.constant 0 : i32
    return %c0_i32, %c0_i32_0 : i32, i32
  }
  func.func @transform_3(%arg0: i32) -> (i32, i32) {
    %c0_i32 = arith.constant 0 : i32
    %c0_i32_0 = arith.constant 0 : i32
    %c0_i32_1 = arith.constant 0 : i32
    return %c0_i32, %c0_i32_0 : i32, i32
  }
  func.func @transform_4(%arg0: i32) -> (i32, i32) {
    %c0_i32 = arith.constant 0 : i32
    %c0_i32_0 = arith.constant 0 : i32
    %c0_i32_1 = arith.constant 0 : i32
    return %c0_i32, %c0_i32_0 : i32, i32
  }
  func.func @transform_5(%arg0: i32) -> (i32, i32) {
    %c0_i32 = arith.constant 0 : i32
    %c0_i32_0 = arith.constant 0 : i32
    return %arg0, %c0_i32 : i32, i32
  }
}

</mosaic_0001>

<bundles_post_ra>
// kernel: tpu_custom_call.1
= control target key start
LH: loop header
LB: loop body
LE: loop exit
PB: predicated region body
PF: predicated region fallthrough
CT: control target
= control target key end

     0   :  { %s4023_s18 = smov 0   ;;  %s5023_s0 = inlined_call_operand.vmem [shape: bf16[256,784], index: 0, kind: input, shape index: {}]   ;;  %s5024_s1 = inlined_call_operand.vmem [shape: bf16[784,20], index: 1, kind: input, shape index: {}]   ;;  %s5025_s2 = inlined_call_operand.vmem [shape: bf16[20,784], index: 2, kind: input, shape index: {}]   ;;  %s5026_s3 = inlined_call_operand.vmem [shape: f32[1,20], index: 3, kind: input, shape index: {}]   ;;  %s5027_s4 = inlined_call_operand.vmem [shape: f32[1,784], index: 4, kind: input, shape index: {}]   ;;  %s5028_s5 = inlined_call_operand.vmem [shape: f32[256,784], index: 5, kind: output, shape index: {}]  }
   0x1 LB: > { %s2842_s19 = sadd.s32 4294967295, %s3990_s18   ;;  %p2846_p0 = scmp.ge.s32.totalorder %s3990_s18, 1  ;;  %s3990_s18 = sphi %s4023_s18, %s15_s18  }
   0x2   : > { %p189_p1 = scmp.lt.s32.totalorder %s3990_s18, 3 }
   0x4   : > { %p190_p2 = pnand %p2846_p0, %p189_p1 }
   0x6   : > { %193 = sbr.rel (%p190_p2) target bundleno = 794 (0x31a), region = 40 }
   0xd   : > { %v3389_v0 = vld [vmem:[%s5024_s1 + $0x40] sm:$0xff]   ;;  %v3393_v4 = vld [vmem:[%s5024_s1 + $0x48] sm:$0xff]   ;;  %v3397_v8 = vld [vmem:[%s5024_s1 + $0x50] sm:$0xff]   ;;  %s2847_s25 = sshll.u32 %s2842_s19, 4  ;;  %vm990_vm0 = vcmask 130048   ;;  %vm1542_vm1 = vcmask 1041408  }
   0xe   : > { %v3390_v1 = vld [vmem:[%s5024_s1] sm:$0xff]   ;;  %3128 = vmatprep.subr.bf16.mxu0 %v3389_v0  ;;  %v3394_v5 = vld [vmem:[%s5024_s1 + $0x8] sm:$0xff]   ;;  %v3398_v9 = vld [vmem:[%s5024_s1 + $0x10] sm:$0xff]   ;;  %p220_p3 = scmp.lt.s32.totalorder %s2847_s25, 31  ;;  %vm1517_vm2 = vcmask 162816  }
   0xf   : > { %v3391_v2 = vld [vmem:[%s5024_s1 + $0xc0] sm:$0xff]   ;;  %3129 = vmatpush3.bf16.msra.mxu0 %v3390_v1  ;;  %v3395_v6 = vld [vmem:[%s5024_s1 + $0xc8] sm:$0xff]   ;;  %v3399_v10 = vld [vmem:[%s5024_s1 + $0xd0] sm:$0xff]  }
  0x10   : > { %v3392_v3 = vld [vmem:[%s5024_s1 + $0x80] sm:$0xff]   ;;  %3192 = vmatprep.subr.bf16.mxu1 %v3391_v2  ;;  %3130 = vmatprep.subr.bf16.mxu0 %v3393_v4  ;;  %v3396_v7 = vld [vmem:[%s5024_s1 + $0x88] sm:$0xff]   ;;  %v3400_v11 = vld [vmem:[%s5024_s1 + $0x90] sm:$0xff]   ;;  %s5034_s25 = smov (!%p220_p3, %s2847_s25), 31 }
  0x11   : > { %3193 = vmatpush3.bf16.msra.mxu1 %v3392_v3  ;;  %v3401_v12 = vld [vmem:[%s5024_s1 + $0x58] sm:$0xff]   ;;  %v3405_v16 = vld [vmem:[%s5024_s1 + $0x60] sm:$0xff]   ;;  %v3409_v20 = vld [vmem:[%s5024_s1 + $0x68] sm:$0xff]   ;;  %s3378_s24 = smul.u32 28, %s5034_s25 }
  0x12   : > { %3194 = vmatprep.subr.bf16.mxu1 %v3395_v6  ;;  %v3402_v13 = vld [vmem:[%s5024_s1 + $0x18] sm:$0xff]   ;;  %v3406_v17 = vld [vmem:[%s5024_s1 + $0x20] sm:$0xff]   ;;  %v3410_v21 = vld [vmem:[%s5024_s1 + $0x28] sm:$0xff]   ;;  %s3379_s9 = smul.u32 56, %s5034_s25 }
  0x13   : > { %3131 = vmatpush3.bf16.msra.mxu0 %v3394_v5  ;;  %v3403_v14 = vld [vmem:[%s5024_s1 + $0xd8] sm:$0xff]   ;;  %v3407_v18 = vld [vmem:[%s5024_s1 + $0xe0] sm:$0xff]   ;;  %v3411_v22 = vld [vmem:[%s5024_s1 + $0xe8] sm:$0xff]   ;;  %s4126_s10 = scalar_lea.vmem %s5023_s0, %s3378_s24 }
  0x14   : > { %3132 = vmatprep.subr.bf16.mxu0 %v3397_v8  ;;  %v3404_v15 = vld [vmem:[%s5024_s1 + $0x98] sm:$0xff]   ;;  %v3408_v19 = vld [vmem:[%s5024_s1 + $0xa0] sm:$0xff]   ;;  %v3412_v23 = vld [vmem:[%s5024_s1 + $0xa8] sm:$0xff]   ;;  %s4515_s12 = scalar_lea.vmem %s5028_s5, %s3379_s9 }
  0x15   : > { %3195 = vmatpush3.bf16.msra.mxu1 %v3396_v7  ;;  %v3413_v24 = vld [vmem:[%s5024_s1 + $0x70] sm:$0xff]   ;;  %v3417_v28 = vld [vmem:[%s5024_s1 + $0x78] sm:$0xff]   ;;  %v3422_v32 = vld [vmem:[%s4126_s10 + $0x4] ss:$28 sps:$4 sm:$0xff]  }
  0x16   : > { %3196 = vmatprep.subr.bf16.mxu1 %v3399_v10  ;;  %v3414_v25 = vld [vmem:[%s5024_s1 + $0x30] sm:$0xff]   ;;  %v3418_v29 = vld [vmem:[%s5024_s1 + $0x38] sm:$0xff]   ;;  %1047 = vmatprep.mubr.bf16.mxu0 %v3422_v32  ;;  %v3424_v34 = vld [vmem:[%s5024_s1 + $0x140] sm:$0xff]  }
  0x17   : > { %3133 = vmatpush3.bf16.msra.mxu0 %v3398_v9  ;;  %v3415_v26 = vld [vmem:[%s5024_s1 + $0xf0] sm:$0xff]   ;;  %v3419_v30 = vld [vmem:[%s5024_s1 + $0xf8] sm:$0xff]   ;;  %v3425_v35 = vld [vmem:[%s4126_s10 + $0x8] ss:$28 sps:$4 sm:$0xff]  }
  0x18   : > { %3134 = vmatprep.subr.bf16.mxu0 %v3401_v12  ;;  %v3416_v27 = vld [vmem:[%s5024_s1 + $0xb0] sm:$0xff]   ;;  %v3420_v31 = vld [vmem:[%s4126_s10] ss:$28 sps:$4 sm:$0xff]   ;;  %v3427_v36 = vld [vmem:[%s4126_s10 + $0xc] ss:$28 sps:$4 sm:$0xff]  }
  0x19   : > { %3197 = vmatpush3.bf16.msra.mxu1 %v3400_v11  ;;  %v3423_v33 = vld [vmem:[%s5024_s1 + $0xb8] sm:$0xff]   ;;  %v3428_v37 = vld [vmem:[%s5024_s1 + $0x100] sm:$0xff]   ;;  %1144 = vmatprep.mubr.bf16.mxu1 %v3427_v36  ;;  %v3433_v41 = vld [vmem:[%s5024_s1 + $0x148] sm:$0xff]  }
  0x1a   : > { %3198 = vmatprep.subr.bf16.mxu1 %v3403_v14  ;;  %v3429_v38 = vld [vmem:[%s5024_s1 + $0x180] sm:$0xff]   ;;  %v3430_v39 = vld [vmem:[%s4126_s10 + $0x3c] ss:$28 sps:$4 sm:$0xff]   ;;  %v3436_v43 = vld [vmem:[%s5024_s1 + $0x108] sm:$0xff]  }
  0x1b   : > { %3135 = vmatpush3.bf16.msra.mxu0 %v3402_v13  ;;  %v3432_v40 = vld [vmem:[%s4126_s10 + $0x38] ss:$28 sps:$4 sm:$0xff]   ;;  %v3434_v42 = vld [vmem:[%s4126_s10 + $0x44] ss:$28 sps:$4 sm:$0xff]   ;;  %v3440_v49 = vld [vmem:[%s4126_s10 + $0x70] ss:$28 sps:$4 sm:$0xff]  }
  0x1c   : > { %3136 = vmatprep.subr.bf16.mxu0 %v3405_v16  ;;  %v3437_v44 = vld [vmem:[%s4126_s10 + $0x40] ss:$28 sps:$4 sm:$0xff]   ;;  %v3438_v45 = vld [vmem:[%s4126_s10 + $0x74] ss:$28 sps:$4 sm:$0xff]   ;;  %v3446_v50 = vld [vmem:[%s4126_s10 + $0xac] ss:$28 sps:$4 sm:$0xff]  }
  0x1d   : > { %3199 = vmatpush3.bf16.msra.mxu1 %v3404_v15  ;;  %v3441_v46 = vld [vmem:[%s5024_s1 + $0x150] sm:$0xff]   ;;  %v3442_v47 = vld [vmem:[%s4126_s10 + $0x7c] ss:$28 sps:$4 sm:$0xff]   ;;  %v3457_v55 = vld [vmem:[%s5024_s1 + $0x160] sm:$0xff]  }
  0x1e   : > { %3200 = vmatprep.subr.bf16.mxu1 %v3407_v18  ;;  %v3444_v48 = vld [vmem:[%s5024_s1 + $0x110] sm:$0xff]   ;;  %v3449_v51 = vld [vmem:[%s5024_s1 + $0x158] sm:$0xff]   ;;  %v3448_v56 = vld [vmem:[%s4126_s10 + $0xa8] ss:$28 sps:$4 sm:$0xff]  }
  0x1f   : > { %3137 = vmatpush3.bf16.msra.mxu0 %v3406_v17  ;;  %v3445_v52 = vld [vmem:[%s4126_s10 + $0x78] ss:$28 sps:$4 sm:$0xff]   ;;  %v3460_v57 = vld [vmem:[%s5024_s1 + $0x120] sm:$0xff]   ;;  %v3453_v59 = vld [vmem:[%s4126_s10 + $0xb0] ss:$28 sps:$4 sm:$0xff]  }
  0x20   : > { %3138 = vmatprep.subr.bf16.mxu0 %v3409_v20  ;;  %v3450_v53 = vld [vmem:[%s4126_s10 + $0xb4] ss:$28 sps:$4 sm:$0xff]   ;;  %v3452_v54 = vld [vmem:[%s5024_s1 + $0x118] sm:$0xff]   ;;  %v3454_v58 = vld [vmem:[%s4126_s10 + $0xe4] ss:$28 sps:$4 sm:$0xff]  }
  0x21   : > { %3201 = vmatpush3.bf16.msra.mxu1 %v3408_v19  ;;  %v3465_v60 = vld [vmem:[%s5024_s1 + $0x168] sm:$0xff]   ;;  %v3456_v63 = vld [vmem:[%s4126_s10 + $0xe0] ss:$28 sps:$4 sm:$0xff]   ;;  %v3473_v0 = vld [vmem:[%s5024_s1 + $0x170] sm:$0xff]  }
  0x22   : > { %3202 = vmatprep.subr.bf16.mxu1 %v3411_v22  ;;  %v3458_v61 = vld [vmem:[%s4126_s10 + $0xec] ss:$28 sps:$4 sm:$0xff]   ;;  %v3462_v1 = vld [vmem:[%s4126_s10 + $0x11c] ss:$28 sps:$4 sm:$0xff]   ;;  %v3476_v2 = vld [vmem:[%s5024_s1 + $0x130] sm:$0xff]  }
  0x23   : > { %3139 = vmatpush3.bf16.msra.mxu0 %v3410_v21  ;;  %v3468_v62 = vld [vmem:[%s5024_s1 + $0x128] sm:$0xff]   ;;  %v3466_v4 = vld [vmem:[%s4126_s10 + $0x124] ss:$28 sps:$4 sm:$0xff]   ;;  %v3481_v5 = vld [vmem:[%s5024_s1 + $0x178] sm:$0xff]  }
  0x24   : > { %3140 = vmatprep.subr.bf16.mxu0 %v3413_v24  ;;  %v3461_v3 = vld [vmem:[%s4126_s10 + $0xe8] ss:$28 sps:$4 sm:$0xff]   ;;  %v3484_v6 = vld [vmem:[%s5024_s1 + $0x138] sm:$0xff]   ;;  %v3470_v8 = vld [vmem:[%s4126_s10 + $0x154] ss:$28 sps:$4 sm:$0xff]  }
  0x25   : > { %3203 = vmatpush3.bf16.msra.mxu1 %v3412_v23  ;;  %v3464_v7 = vld [vmem:[%s4126_s10 + $0x118] ss:$28 sps:$4 sm:$0xff]   ;;  %v3469_v9 = vld [vmem:[%s4126_s10 + $0x120] ss:$28 sps:$4 sm:$0xff]   ;;  %v3472_v11 = vld [vmem:[%s4126_s10 + $0x150] ss:$28 sps:$4 sm:$0xff]  }
  0x26   : > { %3204 = vmatprep.subr.bf16.mxu1 %v3415_v26  ;;  %v3474_v10 = vld [vmem:[%s4126_s10 + $0x15c] ss:$28 sps:$4 sm:$0xff]   ;;  %v3478_v12 = vld [vmem:[%s4126_s10 + $0x18c] ss:$28 sps:$4 sm:$0xff]   ;;  %v3482_v14 = vld [vmem:[%s4126_s10 + $0x194] ss:$28 sps:$4 sm:$0xff]  }
  0x27   : > { %3141 = vmatpush3.bf16.msra.mxu0 %v3414_v25  ;;  %v3477_v13 = vld [vmem:[%s4126_s10 + $0x158] ss:$28 sps:$4 sm:$0xff]   ;;  %v3480_v15 = vld [vmem:[%s4126_s10 + $0x188] ss:$28 sps:$4 sm:$0xff]   ;;  %v3485_v16 = vld [vmem:[%s4126_s10 + $0x190] ss:$28 sps:$4 sm:$0xff]  }
  0x28   : > { %3142 = vmatprep.subr.bf16.mxu0 %v3417_v28  ;;  %v3488_v17 = vld [vmem:[%s4126_s10 + $0x14] ss:$28 sps:$4 sm:$0xff]   ;;  %v3491_v20 = vld [vmem:[%s4126_s10 + $0x4c] ss:$28 sps:$4 sm:$0xff]   ;;  %v3494_v24 = vld [vmem:[%s4126_s10 + $0x84] ss:$28 sps:$4 sm:$0xff]  }
  0x29   : > { %3205 = vmatpush3.bf16.msra.mxu1 %v3416_v27  ;;  %v3489_v18 = vld [vmem:[%s4126_s10 + $0x18] ss:$28 sps:$4 sm:$0xff]   ;;  %v3486_v19 = vld [vmem:[%s4126_s10 + $0x10] ss:$28 sps:$4 sm:$0xff]   ;;  %v3497_v22 = vld [vmem:[%s4126_s10 + $0x88] ss:$28 sps:$4 sm:$0xff]  }
  0x2a   : > { %3206 = vmatprep.subr.bf16.mxu1 %v3419_v30  ;;  %v3490_v21 = vld [vmem:[%s4126_s10 + $0x50] ss:$28 sps:$4 sm:$0xff]   ;;  %v3493_v23 = vld [vmem:[%s4126_s10 + $0x48] ss:$28 sps:$4 sm:$0xff]   ;;  %v3498_v25 = vld [vmem:[%s4126_s10 + $0xc0] ss:$28 sps:$4 sm:$0xff]  }
  0x2b   : > { %3143 = vmatpush3.bf16.msra.mxu0 %v3418_v29  ;;  %v3505_v26 = vld [vmem:[%s4126_s10 + $0xf8] ss:$28 sps:$4 sm:$0xff]   ;;  %v3496_v27 = vld [vmem:[%s4126_s10 + $0x80] ss:$28 sps:$4 sm:$0xff]   ;;  %v3506_v29 = vld [vmem:[%s4126_s10 + $0x130] ss:$28 sps:$4 sm:$0xff]  }
  0x2c   : > { %3256 = vmatprep.subr.bf16.mxu0 %v3424_v34  ;;  %v3499_v28 = vld [vmem:[%s4126_s10 + $0xbc] ss:$28 sps:$4 sm:$0xff]   ;;  %v3513_v30 = vld [vmem:[%s4126_s10 + $0x168] ss:$28 sps:$4 sm:$0xff]   ;;  %v3502_v32 = vld [vmem:[%s4126_s10 + $0xf4] ss:$28 sps:$4 sm:$0xff]  }
  0x2d   : > { %3207 = vmatpush3.bf16.msra.mxu1 %v3423_v33  ;;  %v3514_v33 = vld [vmem:[%s4126_s10 + $0x1a0] ss:$28 sps:$4 sm:$0xff]   ;;  %v3504_v34 = vld [vmem:[%s4126_s10 + $0xf0] ss:$28 sps:$4 sm:$0xff]   ;;  %v3509_v36 = vld [vmem:[%s4126_s10 + $0x128] ss:$28 sps:$4 sm:$0xff]  }
  0x2e   : > { %1048 = vmatmul.mubr.bf16.vlgmr.msra.gmra.mrb[0].mxu0 %v3420_v31  ;;  %3339 = vmatprep.subr.bf16.mxu1 %v3429_v38  ;;  %v3501_v31 = vld [vmem:[%s4126_s10 + $0xb8] ss:$28 sps:$4 sm:$0xff]  }
  0x2f   : > { %3257 = vmatpush3.bf16.msra.mxu0 %v3428_v37  ;;  %1055 = vmatprep.mubr.bf16.mxu0 %v3430_v39  ;;  %v3510_v37 = vld [vmem:[%s4126_s10 + $0x164] ss:$28 sps:$4 sm:$0xff]   ;;  %v3515_v39 = vld [vmem:[%s4126_s10 + $0x19c] ss:$28 sps:$4 sm:$0xff]  }
  0x30   : > { %1145 = vmatmul.mubr.bf16.vlgmr.msra.gmra.mrb[0].mxu1 %v3425_v35  ;;  %3258 = vmatprep.subr.bf16.mxu0 %v3433_v41  ;;  %v3507_v35 = vld [vmem:[%s4126_s10 + $0x12c] ss:$28 sps:$4 sm:$0xff]   ;;  %v3518_v41 = vld [vmem:[%s5025_s2] ss:$28 sps:$4 sm:$0xff]  }
  0x31   : > { %3340 = vmatpush3.bf16.msra.mxu1 %v3429_v38  ;;  %1152 = vmatprep.mubr.bf16.mxu1 %v3434_v42  ;;  %v3512_v38 = vld [vmem:[%s4126_s10 + $0x160] ss:$28 sps:$4 sm:$0xff]  }
  0x32   : > { %v3520_v42 = vld [vmem:[%s5025_s2 + $0x4] ss:$28 sps:$4 sm:$0xff]  }
  0x33   : > { %3259 = vmatpush3.bf16.msra.mxu0 %v3436_v43  ;;  %v3521_v43 = vld [vmem:[%s5025_s2 + $0x8] ss:$28 sps:$4 sm:$0xff]   ;;  %1564 = vmatprep.subr.bf16.mxu1 %v3520_v42 }
  0x34   : > { %3260 = vmatprep.subr.bf16.mxu0 %v3441_v46 }
  0x36   : > { %1056 = vmatmul.mubr.bf16.gmra.mrb[4].mxu0 %v3432_v40  ;;  %v3517_v40 = vld [vmem:[%s4126_s10 + $0x198] ss:$28 sps:$4 sm:$0xff]  }
  0x37   : > { %1063 = vmatprep.mubr.bf16.mxu0 %v3438_v45  ;;  %3261 = vmatpush3.bf16.msra.mxu0 %v3444_v48  ;;  %v404_v45 = vld [vmem:[%s5025_s2 + $0x38] sm:$0x33] }
  0x38   : > { %1153 = vmatmul.mubr.bf16.gmra.mrb[4].mxu1 %v3437_v44  ;;  %3262 = vmatprep.subr.bf16.mxu0 %v3449_v51  ;;  %v3523_v44 = vld [vmem:[%s5025_s2 + $0xc] ss:$28 sps:$4 sm:$0xff]   ;;  %v2973_v46 = vcombine.high %v404_v45, %v404_v45 }
  0x39   : > { %1160 = vmatprep.mubr.bf16.mxu1 %v3442_v47  ;;  %v2972_v47 = vcombine.low %v404_v45, %v404_v45 }
  0x3b   : > { %3263 = vmatpush3.bf16.msra.mxu0 %v3452_v54  ;;  %v1544_v48 = vsel %vm1542_vm1, %v2972_v47, 0  ;;  %v3530_v54 = vld [vmem:[%s5025_s2 + $0x14] ss:$28 sps:$4 sm:$0xff]  }
  0x3c   : > { %3264 = vmatprep.subr.bf16.mxu0 %v3457_v55  ;;  %v4282_v55 = vld [vmem:[%s5025_s2 + $0x18] ss:$28 sps:$4 sm:$0xff]  }
  0x3e   : > { %1064 = vmatmul.mubr.bf16.gmra.mrb[8].mxu0 %v3440_v49  ;;  %v405_v49 = vld [vmem:[%s5025_s2 + $0x40] sm:$0x33] }
  0x3f   : > { %1071 = vmatprep.mubr.bf16.mxu0 %v3446_v50  ;;  %3265 = vmatpush3.bf16.msra.mxu0 %v3460_v57  ;;  %v2975_v50 = vcombine.high %v405_v49, %v405_v49  ;;  %v2974_v51 = vcombine.low %v405_v49, %v405_v49  ;;  %v4288_v57 = vld [vmem:[%s5026_s3] ss:$0 sm:$0xff] }
  0x40   : > { %1161 = vmatmul.mubr.bf16.gmra.mrb[8].mxu1 %v3445_v52  ;;  %3266 = vmatprep.subr.bf16.mxu0 %v3465_v60 }
  0x41   : > { %1168 = vmatprep.mubr.bf16.mxu1 %v3450_v53  ;;  %v1550_v52 = vsel %vm1542_vm1, %v2974_v51, 0  ;;  %v3992_v53 = vmov 0  }
  0x43   : > { %3267 = vmatpush3.bf16.msra.mxu0 %v3468_v62 }
  0x44   : > { %3268 = vmatprep.subr.bf16.mxu0 %v3473_v0 }
  0x46   : > { %1072 = vmatmul.mubr.bf16.gmra.mrb[12].mxu0 %v3448_v56 }
  0x47   : > { %1079 = vmatprep.mubr.bf16.mxu0 %v3454_v58  ;;  %3269 = vmatpush3.bf16.msra.mxu0 %v3476_v2 }
  0x48   : > { %1169 = vmatmul.mubr.bf16.gmra.mrb[12].mxu1 %v3453_v59  ;;  %3270 = vmatprep.subr.bf16.mxu0 %v3481_v5 }
  0x49   : > { %1176 = vmatprep.mubr.bf16.mxu1 %v3458_v61 }
  0x4b   : > { %3271 = vmatpush3.bf16.msra.mxu0 %v3484_v6 }
  0x4c   : > { %1677 = vmatprep.subr.bf16.mxu0 %v3523_v44 }
  0x4e   : > { %1080 = vmatmul.mubr.bf16.gmra.mrb[16].mxu0 %v3456_v63 }
  0x4f   : > { %1087 = vmatprep.mubr.bf16.mxu0 %v3462_v1 }
  0x50   : > { %1177 = vmatmul.mubr.bf16.gmra.mrb[16].mxu1 %v3461_v3 }
  0x51   : > { %1184 = vmatprep.mubr.bf16.mxu1 %v3466_v4 }
  0x56   : > { %1088 = vmatmul.mubr.bf16.gmra.mrb[20].mxu0 %v3464_v7 }
  0x57   : > { %1095 = vmatprep.mubr.bf16.mxu0 %v3470_v8 }
  0x58   : > { %1185 = vmatmul.mubr.bf16.gmra.mrb[20].mxu1 %v3469_v9 }
  0x59   : > { %1192 = vmatprep.mubr.bf16.mxu1 %v3474_v10 }
  0x5e   : > { %1096 = vmatmul.mubr.bf16.gmra.mrb[24].mxu0 %v3472_v11 }
  0x5f   : > { %1103 = vmatprep.mubr.bf16.mxu0 %v3478_v12 }
  0x60   : > { %1193 = vmatmul.mubr.bf16.gmra.mrb[24].mxu1 %v3477_v13 }
  0x61   : > { %1200 = vmatprep.mubr.bf16.mxu1 %v3482_v14 }
  0x66   : > { %1104 = vmatmul.mubr.bf16.gmra.mrb[28].mxu0 %v3480_v15 }
  0x67   : > { %1241 = vmatprep.mubr.bf16.mxu0 %v3488_v17 }
  0x68   : > { %1201 = vmatmul.mubr.bf16.gmra.mrb[28].mxu1 %v3485_v16 }
  0x69   : > { %3341 = vmatprep.mubr.msk.bf16.mxu1 %vm990_vm0, %v3489_v18 }
  0x6e   : > { %1242 = vmatmul.mubr.bf16.vlgmr.msra.gmra.mrb[32].mxu0 %v3486_v19 }
  0x6f   : > { %1249 = vmatprep.mubr.bf16.mxu0 %v3491_v20  ;;  %1678 = vmatpush1.bf16.msra.mxu0 %v3521_v43 }
  0x70   : > { %3342 = vmatmul.mubr.msk.bf16.vlgmr.msra.gmra.mrb[32].mxu1 %vm990_vm0, %v3490_v21  ;;  %2988 = vmatprep.subr.msk.bf16.mxu0 %vm1542_vm1, %v2975_v50 }
  0x71   : > { %3345 = vmatprep.mubr.msk.bf16.mxu1 %vm990_vm0, %v3497_v22  ;;  %1565 = vmatpush1.bf16.msra.mxu1 %v3518_v41 }
  0x72   : > { %2979 = vmatprep.subr.msk.bf16.mxu1 %vm1542_vm1, %v2973_v46 }
  0x73   : > { %1680 = vmatpush1.bf16.msra.mxu0 %v1550_v52 }
  0x74   : > { %3357 = vmatprep.subr.bf16.mxu0 %v4282_v55 }
  0x75   : > { %1567 = vmatpush1.bf16.msra.mxu1 %v1544_v48 }
  0x76   : > { %1250 = vmatmul.mubr.bf16.gmra.mrb[36].mxu0 %v3493_v23  ;;  %1790 = vmatprep.subr.bf16.mxu1 %v3530_v54 }
  0x77   : > { %1257 = vmatprep.mubr.bf16.mxu0 %v3494_v24 }
  0x78   : > { %3346 = vmatmul.mubr.msk.bf16.gmra.mrb[36].mxu1 %vm990_vm0, %v3498_v25 }
  0x79   : > { %3349 = vmatprep.mubr.msk.bf16.mxu1 %vm990_vm0, %v3505_v26 }
  0x7e   : > { %1258 = vmatmul.mubr.bf16.gmra.mrb[40].mxu0 %v3496_v27 }
  0x7f   : > { %1265 = vmatprep.mubr.bf16.mxu0 %v3499_v28 }
  0x80   : > { %3350 = vmatmul.mubr.msk.bf16.gmra.mrb[40].mxu1 %vm990_vm0, %v3506_v29 }
  0x81   : > { %3353 = vmatprep.mubr.msk.bf16.mxu1 %vm990_vm0, %v3513_v30 }
  0x86   : > { %1266 = vmatmul.mubr.bf16.gmra.mrb[44].mxu0 %v3501_v31 }
  0x87   : > { %1273 = vmatprep.mubr.bf16.mxu0 %v3502_v32 }
  0x88   : > { %3354 = vmatmul.mubr.msk.bf16.gmra.mrb[44].mxu1 %vm990_vm0, %v3514_v33 }
  0x89   : > { %1596 = vmatprep.mubr.bf16.mxu1 %v3992_v53 }
  0x8e   : > { %1274 = vmatmul.mubr.bf16.gmra.mrb[48].mxu0 %v3504_v34 }
  0x8f   : > { %1281 = vmatprep.mubr.bf16.mxu0 %v3507_v35 }
  0x96   : > { %1282 = vmatmul.mubr.bf16.gmra.mrb[52].mxu0 %v3509_v36 }
  0x97   : > { %1289 = vmatprep.mubr.bf16.mxu0 %v3510_v37 }
  0x9e   : > { %1290 = vmatmul.mubr.bf16.gmra.mrb[56].mxu0 %v3512_v38 }
  0x9f   : > { %1297 = vmatprep.mubr.bf16.mxu0 %v3515_v39 }
  0xa6   : > { %1298 = vmatmul.mubr.bf16.gmra.mrb[60].mxu0 %v3517_v40 }
  0xa7   : > { %1709 = vmatprep.mubr.bf16.mxu0 %v3992_v53 }
 0x101   : > { %v3144_v56 = vpop.f32.mrb[0].mxu0 }
 0x102   : > { %v3145_v58 = vpop.f32.mrb[1].mxu0 }
 0x103   : > { %v3146_v59 = vadd.f32 %v3145_v58, %v3144_v56  ;;  %v3147_v60 = vpop.f32.mrb[2].mxu0  ;;  %v3208_v61 = vpop.f32.mrb[0].mxu1 }
 0x104   : > { %v3148_v62 = vpop.f32.mrb[3].mxu0  ;;  %v3209_v1 = vpop.f32.mrb[1].mxu1 }
 0x105   : > { %v1050_v63 = vadd.f32 %v3146_v59, %v4288_v57  ;;  %v3149_v0 = vadd.f32 %v3148_v62, %v3147_v60  ;;  %v3210_v2 = vadd.f32 %v3209_v1, %v3208_v61  ;;  %v3211_v3 = vpop.f32.mrb[2].mxu1 }
 0x106   : > { %v3212_v5 = vpop.f32.mrb[3].mxu1 }
 0x107   : > { %v1053_v4 = vadd.f32 %v3149_v0, %v4288_v57  ;;  %v4292_v6 = vadd.f32 %v3210_v2, %v1050_v63  ;;  %v3213_v7 = vadd.f32 %v3212_v5, %v3211_v3 }
 0x109   : > { %v3150_v8 = vpop.f32.mrb[4].mxu0  ;;  %v4294_v9 = vadd.f32 %v3213_v7, %v1053_v4 }
 0x10a   : > { %v3151_v10 = vpop.f32.mrb[5].mxu0 }
 0x10b   : > { %v3152_v11 = vadd.f32 %v3151_v10, %v3150_v8  ;;  %v3153_v12 = vpop.f32.mrb[6].mxu0  ;;  %v3214_v13 = vpop.f32.mrb[4].mxu1 }
 0x10c   : > { %v3154_v14 = vpop.f32.mrb[7].mxu0  ;;  %v3215_v17 = vpop.f32.mrb[5].mxu1 }
 0x10d   : > { %v1058_v15 = vadd.f32 %v3152_v11, %v4288_v57  ;;  %v3155_v16 = vadd.f32 %v3154_v14, %v3153_v12  ;;  %v3216_v18 = vadd.f32 %v3215_v17, %v3214_v13  ;;  %v3217_v19 = vpop.f32.mrb[6].mxu1 }
 0x10e   : > { %v3218_v21 = vpop.f32.mrb[7].mxu1 }
 0x10f   : > { %v1061_v20 = vadd.f32 %v3155_v16, %v4288_v57  ;;  %v4298_v22 = vadd.f32 %v3216_v18, %v1058_v15  ;;  %v3219_v23 = vadd.f32 %v3218_v21, %v3217_v19 }
 0x111   : > { %v3156_v24 = vpop.f32.mrb[8].mxu0  ;;  %v4300_v25 = vadd.f32 %v3219_v23, %v1061_v20 }
 0x112   : > { %v3157_v26 = vpop.f32.mrb[9].mxu0 }
 0x113   : > { %v3158_v27 = vadd.f32 %v3157_v26, %v3156_v24  ;;  %v3159_v28 = vpop.f32.mrb[10].mxu0  ;;  %v3220_v29 = vpop.f32.mrb[8].mxu1 }
 0x114   : > { %v3160_v30 = vpop.f32.mrb[11].mxu0  ;;  %v3221_v33 = vpop.f32.mrb[9].mxu1 }
 0x115   : > { %v1066_v31 = vadd.f32 %v3158_v27, %v4288_v57  ;;  %v3161_v32 = vadd.f32 %v3160_v30, %v3159_v28  ;;  %v3222_v34 = vadd.f32 %v3221_v33, %v3220_v29  ;;  %v3223_v35 = vpop.f32.mrb[10].mxu1 }
 0x116   : > { %v3224_v37 = vpop.f32.mrb[11].mxu1 }
 0x117   : > { %v1069_v36 = vadd.f32 %v3161_v32, %v4288_v57  ;;  %v4304_v38 = vadd.f32 %v3222_v34, %v1066_v31  ;;  %v3225_v39 = vadd.f32 %v3224_v37, %v3223_v35 }
 0x119   : > { %v3162_v40 = vpop.f32.mrb[12].mxu0  ;;  %v4306_v41 = vadd.f32 %v3225_v39, %v1069_v36 }
 0x11a   : > { %v3163_v42 = vpop.f32.mrb[13].mxu0 }
 0x11b   : > { %v3164_v43 = vadd.f32 %v3163_v42, %v3162_v40  ;;  %v3165_v44 = vpop.f32.mrb[14].mxu0  ;;  %v3226_v45 = vpop.f32.mrb[12].mxu1 }
 0x11c   : > { %v3166_v46 = vpop.f32.mrb[15].mxu0  ;;  %v3227_v49 = vpop.f32.mrb[13].mxu1 }
 0x11d   : > { %v1074_v47 = vadd.f32 %v3164_v43, %v4288_v57  ;;  %v3167_v48 = vadd.f32 %v3166_v46, %v3165_v44  ;;  %v3228_v50 = vadd.f32 %v3227_v49, %v3226_v45  ;;  %v3229_v51 = vpop.f32.mrb[14].mxu1 }
 0x11e   : > { %v3230_v54 = vpop.f32.mrb[15].mxu1 }
 0x11f   : > { %v1077_v52 = vadd.f32 %v3167_v48, %v4288_v57  ;;  %v4310_v56 = vadd.f32 %v3228_v50, %v1074_v47  ;;  %v3231_v58 = vadd.f32 %v3230_v54, %v3229_v51 }
 0x121   : > { %v3168_v59 = vpop.f32.mrb[16].mxu0  ;;  %v4312_v60 = vadd.f32 %v3231_v58, %v1077_v52 }
 0x122   : > { %v3169_v61 = vpop.f32.mrb[17].mxu0 }
 0x123   : > { %v3170_v62 = vadd.f32 %v3169_v61, %v3168_v59  ;;  %v3171_v63 = vpop.f32.mrb[18].mxu0  ;;  %v3232_v0 = vpop.f32.mrb[16].mxu1 }
 0x124   : > { %v3172_v1 = vpop.f32.mrb[19].mxu0  ;;  %v3233_v4 = vpop.f32.mrb[17].mxu1 }
 0x125   : > { %v1082_v2 = vadd.f32 %v3170_v62, %v4288_v57  ;;  %v3173_v3 = vadd.f32 %v3172_v1, %v3171_v63  ;;  %v3234_v5 = vadd.f32 %v3233_v4, %v3232_v0  ;;  %v3235_v7 = vpop.f32.mrb[18].mxu1 }
 0x126   : > { %v3236_v10 = vpop.f32.mrb[19].mxu1 }
 0x127   : > { %v1085_v8 = vadd.f32 %v3173_v3, %v4288_v57  ;;  %v4316_v11 = vadd.f32 %v3234_v5, %v1082_v2  ;;  %v3237_v12 = vadd.f32 %v3236_v10, %v3235_v7 }
 0x129   : > { %v3174_v13 = vpop.f32.mrb[20].mxu0  ;;  %v4318_v14 = vadd.f32 %v3237_v12, %v1085_v8 }
 0x12a   : > { %v3175_v15 = vpop.f32.mrb[21].mxu0 }
 0x12b   : > { %v3176_v16 = vadd.f32 %v3175_v15, %v3174_v13  ;;  %v3177_v17 = vpop.f32.mrb[22].mxu0  ;;  %v3238_v18 = vpop.f32.mrb[20].mxu1 }
 0x12c   : > { %v3178_v19 = vpop.f32.mrb[23].mxu0  ;;  %v3239_v23 = vpop.f32.mrb[21].mxu1 }
 0x12d   : > { %v1090_v20 = vadd.f32 %v3176_v16, %v4288_v57  ;;  %v3179_v21 = vadd.f32 %v3178_v19, %v3177_v17  ;;  %v3240_v24 = vadd.f32 %v3239_v23, %v3238_v18  ;;  %v3241_v26 = vpop.f32.mrb[22].mxu1 }
 0x12e   : > { %v3242_v28 = vpop.f32.mrb[23].mxu1 }
 0x12f   : > { %v1093_v27 = vadd.f32 %v3179_v21, %v4288_v57  ;;  %v4322_v29 = vadd.f32 %v3240_v24, %v1090_v20  ;;  %v3243_v30 = vadd.f32 %v3242_v28, %v3241_v26 }
 0x131   : > { %v3180_v31 = vpop.f32.mrb[24].mxu0  ;;  %v4324_v32 = vadd.f32 %v3243_v30, %v1093_v27  ;;  %v406_v27 = vld [vmem:[%s5025_s2 + $0x48] sm:$0x33] }
 0x132   : > { %v3181_v33 = vpop.f32.mrb[25].mxu0 }
 0x133   : > { %v3182_v34 = vadd.f32 %v3181_v33, %v3180_v31  ;;  %v3183_v35 = vpop.f32.mrb[26].mxu0  ;;  %v3244_v36 = vpop.f32.mrb[24].mxu1 }
 0x134   : > { %v3184_v37 = vpop.f32.mrb[27].mxu0  ;;  %v3245_v42 = vpop.f32.mrb[25].mxu1 }
 0x135   : > { %v1098_v39 = vadd.f32 %v3182_v34, %v4288_v57  ;;  %v3185_v40 = vadd.f32 %v3184_v37, %v3183_v35  ;;  %v3246_v43 = vadd.f32 %v3245_v42, %v3244_v36  ;;  %v3247_v44 = vpop.f32.mrb[26].mxu1 }
 0x136   : > { %v3248_v46 = vpop.f32.mrb[27].mxu1 }
 0x137   : > { %v1101_v45 = vadd.f32 %v3185_v40, %v4288_v57  ;;  %v4328_v47 = vadd.f32 %v3246_v43, %v1098_v39  ;;  %v3249_v48 = vadd.f32 %v3248_v46, %v3247_v44  ;;  %v2976_v43 = vcombine.low %v406_v27, %v406_v27 }
 0x139   : > { %v3186_v49 = vpop.f32.mrb[28].mxu0  ;;  %v4330_v50 = vadd.f32 %v3249_v48, %v1101_v45 }
 0x13a   : > { %v3187_v51 = vpop.f32.mrb[29].mxu0 }
 0x13b   : > { %v3188_v52 = vadd.f32 %v3187_v51, %v3186_v49  ;;  %v3189_v54 = vpop.f32.mrb[30].mxu0  ;;  %v3250_v58 = vpop.f32.mrb[28].mxu1  ;;  %v3534_v49 = vld [vmem:[%s5025_s2 + $0x50] ss:$0 sps:$4 sm:$0x33]  }
 0x13c   : > { %v3190_v59 = vpop.f32.mrb[31].mxu0  ;;  %v3251_v63 = vpop.f32.mrb[29].mxu1 }
 0x13d   : > { %v1106_v61 = vadd.f32 %v3188_v52, %v4288_v57  ;;  %v3191_v62 = vadd.f32 %v3190_v59, %v3189_v54  ;;  %v3252_v0 = vadd.f32 %v3251_v63, %v3250_v58  ;;  %v3253_v1 = vpop.f32.mrb[30].mxu1 }
 0x13e   : > { %v3254_v3 = vpop.f32.mrb[31].mxu1 }
 0x13f   : > { %v1109_v2 = vadd.f32 %v3191_v62, %v4288_v57  ;;  %v4334_v4 = vadd.f32 %v3252_v0, %v1106_v61  ;;  %v3255_v5 = vadd.f32 %v3254_v3, %v3253_v1  ;;  %v1562_v62 = vsel %vm1542_vm1, %v3534_v49, 0 }
 0x141   : > { %v3272_v7 = vpop.f32.mrb[32].mxu0  ;;  %v4336_v8 = vadd.f32 %v3255_v5, %v1109_v2 }
 0x142   : > { %v3273_v10 = vpop.f32.mrb[33].mxu0 }
 0x143   : > { %v3274_v12 = vadd.f32 %v3273_v10, %v3272_v7  ;;  %v3275_v13 = vpop.f32.mrb[34].mxu0  ;;  %v3343_v15 = vpop.f32.mrb[32].mxu1 }
 0x144   : > { %v3276_v16 = vpop.f32.mrb[35].mxu0  ;;  %v1340_v19 = vpop.f32.mrb[33].mxu1 }
 0x145   : > { %v3277_v17 = vadd.f32 %v3276_v16, %v3275_v13  ;;  %v1244_v18 = vadd.f32 %v3274_v12, %v4292_v6  ;;  %v3344_v20 = vpop.f32.mrb[34].mxu1  ;;  %v3528_v6 = vld [vmem:[%s5025_s2 + $0x10] ss:$28 sps:$4 sm:$0xff]  }
 0x146   : > { %v1343_v23 = vpop.f32.mrb[35].mxu1 }
 0x147   : > { %v1341_v21 = vadd.f32 %v1340_v19, %v1244_v18  ;;  %v1247_v57 = vadd.f32 %v3277_v17, %v4294_v9  ;;  %v2977_v9 = vcombine.high %v406_v27, %v406_v27 }
 0x149   : > { %v1344_v24 = vadd.f32 %v1343_v23, %v1247_v57  ;;  %v3278_v26 = vpop.f32.mrb[36].mxu0  ;;  %v1403_v30 = vmax.f32 %v1341_v21, 0.0 }
 0x14a   : > { %v3279_v28 = vpop.f32.mrb[37].mxu0 }
 0x14b   : > { %v1404_v31 = vmax.f32 %v1344_v24, 0.0  ;;  %v3280_v33 = vadd.f32 %v3279_v28, %v3278_v26  ;;  %v3281_v34 = vpop.f32.mrb[38].mxu0  ;;  %v3347_v36 = vpop.f32.mrb[36].mxu1 }
 0x14c   : > { %v3282_v35 = vpop.f32.mrb[39].mxu0  ;;  %v1356_v42 = vpop.f32.mrb[37].mxu1 }
 0x14d   : > { %v4346_v37 = vpack.c.bf16 %v1404_v31, %v1403_v30  ;;  %v1252_v39 = vadd.f32 %v3280_v33, %v4298_v22  ;;  %v3283_v40 = vadd.f32 %v3282_v35, %v3281_v34  ;;  %v3348_v44 = vpop.f32.mrb[38].mxu1 }
 0x14e   : > { %v1359_v48 = vpop.f32.mrb[39].mxu1 }
 0x14f   : > { %v1349_v45 = vadd.f32 %v3343_v15, %v1252_v39  ;;  %v1255_v46 = vadd.f32 %v3283_v40, %v4300_v25  ;;  %2980 = vmatmul.mubr.msk.bf16.vlgmr.msra.gmra.mrb[48].mxu1 %vm1517_vm2, %v4346_v37  ;;  %2989 = vmatmul.mubr.msk.bf16.vlgmr.msra.gmra.mrb[64].mxu0 %vm1517_vm2, %v4346_v37  ;;  %v1556_v25 = vsel %vm1542_vm1, %v2976_v43, 0 }
 0x150   : > { %1791 = vmatpush1.bf16.msra.mxu1 %v3528_v6  ;;  %1606 = vmatprep.mubr.bf16.mxu1 %v3992_v53 }
 0x151   : > { %v1352_v22 = vadd.f32 %v3344_v20, %v1255_v46  ;;  %v3284_v51 = vpop.f32.mrb[40].mxu0  ;;  %1719 = vmatprep.mubr.bf16.mxu0 %v3992_v53  ;;  %2997 = vmatprep.subr.msk.bf16.mxu1 %vm1542_vm1, %v2977_v9  ;;  %v1405_v54 = vmax.f32 %v1349_v45, 0.0 }
 0x152   : > { %v3285_v52 = vpop.f32.mrb[41].mxu0  ;;  %3358 = vmatpush3.bf16.msra.mxu0 %v4282_v55 }
 0x153   : > { %v1406_v58 = vmax.f32 %v1352_v22, 0.0  ;;  %v3286_v59 = vadd.f32 %v3285_v52, %v3284_v51  ;;  %v3287_v61 = vpop.f32.mrb[42].mxu0  ;;  %3377 = vmatprep.subr.msk.bf16.mxu0 %vm1542_vm1, %v3534_v49  ;;  %v4364_v0 = vpop.f32.mrb[40].mxu1 }
 0x154   : > { %v3288_v63 = vpop.f32.mrb[43].mxu0  ;;  %1793 = vmatpush1.bf16.msra.mxu1 %v1556_v25  ;;  %v1372_v5 = vpop.f32.mrb[41].mxu1 }
 0x155   : > { %v4366_v1 = vpack.c.bf16 %v1406_v58, %v1405_v54  ;;  %v3289_v2 = vadd.f32 %v3288_v63, %v3287_v61  ;;  %v1260_v3 = vadd.f32 %v3286_v59, %v4304_v38  ;;  %v4369_v7 = vpop.f32.mrb[42].mxu1 }
 0x156   : > { %3360 = vmatpush3.bf16.msra.mxu0 %v1562_v62  ;;  %v1375_v12 = vpop.f32.mrb[43].mxu1 }
 0x157   : > { %v1357_v55 = vadd.f32 %v1356_v42, %v1260_v3  ;;  %v1263_v10 = vadd.f32 %v3289_v2, %v4306_v41  ;;  %2981 = vmatmul.mubr.msk.bf16.gmra.mrb[52].mxu1 %vm1517_vm2, %v4366_v1  ;;  %2990 = vmatmul.mubr.msk.bf16.gmra.mrb[68].mxu0 %vm1517_vm2, %v4366_v1 }
 0x158   : > { %1616 = vmatprep.mubr.bf16.mxu1 %v3992_v53  ;;  %1729 = vmatprep.mubr.bf16.mxu0 %v3992_v53 }
 0x159   : > { %v1360_v13 = vadd.f32 %v1359_v48, %v1263_v10  ;;  %v3290_v38 = vpop.f32.mrb[44].mxu0  ;;  %v1407_v16 = vmax.f32 %v1357_v55, 0.0 }
 0x15a   : > { %v3291_v15 = vpop.f32.mrb[45].mxu0 }
 0x15b   : > { %v1408_v17 = vmax.f32 %v1360_v13, 0.0  ;;  %v3292_v18 = vadd.f32 %v3291_v15, %v3290_v38  ;;  %v3293_v19 = vpop.f32.mrb[46].mxu0  ;;  %v4378_v41 = vpop.f32.mrb[44].mxu1 }
 0x15c   : > { %v3294_v20 = vpop.f32.mrb[47].mxu0  ;;  %v1388_v24 = vpop.f32.mrb[45].mxu1 }
 0x15d   : > { %v4380_v21 = vpack.c.bf16 %v1408_v17, %v1407_v16  ;;  %v1268_v57 = vadd.f32 %v3292_v18, %v4310_v56  ;;  %v3295_v23 = vadd.f32 %v3294_v20, %v3293_v19  ;;  %v4383_v26 = vpop.f32.mrb[46].mxu1 }
 0x15e   : > { %v1391_v30 = vpop.f32.mrb[47].mxu1 }
 0x15f   : > { %v1365_v27 = vadd.f32 %v3347_v36, %v1268_v57  ;;  %v1271_v28 = vadd.f32 %v3295_v23, %v4312_v60  ;;  %2982 = vmatmul.mubr.msk.bf16.gmra.mrb[56].mxu1 %vm1517_vm2, %v4380_v21  ;;  %2991 = vmatmul.mubr.msk.bf16.gmra.mrb[72].mxu0 %vm1517_vm2, %v4380_v21 }
 0x160   : > { %1626 = vmatprep.mubr.bf16.mxu1 %v3992_v53  ;;  %1739 = vmatprep.mubr.bf16.mxu0 %v3992_v53 }
 0x161   : > { %v1368_v31 = vadd.f32 %v3348_v44, %v1271_v28  ;;  %v3296_v56 = vpop.f32.mrb[48].mxu0  ;;  %v1409_v34 = vmax.f32 %v1365_v27, 0.0 }
 0x162   : > { %v3297_v33 = vpop.f32.mrb[49].mxu0 }
 0x163   : > { %v1410_v35 = vmax.f32 %v1368_v31, 0.0  ;;  %v3298_v6 = vadd.f32 %v3297_v33, %v3296_v56  ;;  %v3299_v36 = vpop.f32.mrb[50].mxu0 }
 0x164   : > { %v3300_v9 = vpop.f32.mrb[51].mxu0 }
 0x165   : > { %v4392_v60 = vpack.c.bf16 %v1410_v35, %v1409_v34  ;;  %v3301_v39 = vadd.f32 %v3300_v9, %v3299_v36  ;;  %v1276_v40 = vadd.f32 %v3298_v6, %v4316_v11 }
 0x167   : > { %v1373_v42 = vadd.f32 %v1372_v5, %v1276_v40  ;;  %v1279_v43 = vadd.f32 %v3301_v39, %v4318_v14  ;;  %2983 = vmatmul.mubr.msk.bf16.gmra.mrb[60].mxu1 %vm1517_vm2, %v4392_v60  ;;  %2992 = vmatmul.mubr.msk.bf16.gmra.mrb[76].mxu0 %vm1517_vm2, %v4392_v60 }
 0x168   : > { %1636 = vmatprep.mubr.bf16.mxu1 %v3992_v53  ;;  %1749 = vmatprep.mubr.bf16.mxu0 %v3992_v53 }
 0x169   : > { %v1376_v44 = vadd.f32 %v1375_v12, %v1279_v43  ;;  %v3302_v45 = vpop.f32.mrb[52].mxu0  ;;  %v1411_v48 = vmax.f32 %v1373_v42, 0.0 }
 0x16a   : > { %v3303_v46 = vpop.f32.mrb[53].mxu0 }
 0x16b   : > { %v1412_v49 = vmax.f32 %v1376_v44, 0.0  ;;  %v3304_v22 = vadd.f32 %v3303_v46, %v3302_v45  ;;  %v3305_v11 = vpop.f32.mrb[54].mxu0 }
 0x16c   : > { %v3306_v51 = vpop.f32.mrb[55].mxu0 }
 0x16d   : > { %v4402_v25 = vpack.c.bf16 %v1412_v49, %v1411_v48  ;;  %v1284_v14 = vadd.f32 %v3304_v22, %v4322_v29  ;;  %v3307_v52 = vadd.f32 %v3306_v51, %v3305_v11 }
 0x16f   : > { %v1381_v54 = vadd.f32 %v4364_v0, %v1284_v14  ;;  %v1287_v58 = vadd.f32 %v3307_v52, %v4324_v32  ;;  %2984 = vmatmul.mubr.msk.bf16.gmra.mrb[64].mxu1 %vm1517_vm2, %v4402_v25  ;;  %2993 = vmatmul.mubr.msk.bf16.gmra.mrb[80].mxu0 %vm1517_vm2, %v4402_v25 }
 0x170   : > { %1646 = vmatprep.mubr.bf16.mxu1 %v3992_v53  ;;  %1759 = vmatprep.mubr.bf16.mxu0 %v3992_v53 }
 0x171   : > { %v1384_v59 = vadd.f32 %v4369_v7, %v1287_v58  ;;  %v3308_v61 = vpop.f32.mrb[56].mxu0  ;;  %v1413_v29 = vmax.f32 %v1381_v54, 0.0 }
 0x172   : > { %v3309_v62 = vpop.f32.mrb[57].mxu0 }
 0x173   : > { %v1414_v63 = vmax.f32 %v1384_v59, 0.0  ;;  %v3310_v2 = vadd.f32 %v3309_v62, %v3308_v61  ;;  %v3311_v0 = vpop.f32.mrb[58].mxu0 }
 0x174   : > { %v3312_v3 = vpop.f32.mrb[59].mxu0 }
 0x175   : > { %v1424_v32 = vpack.c.bf16 %v1414_v63, %v1413_v29  ;;  %v3313_v5 = vadd.f32 %v3312_v3, %v3311_v0  ;;  %v1292_v55 = vadd.f32 %v3310_v2, %v4328_v47 }
 0x177   : > { %v1389_v10 = vadd.f32 %v1388_v24, %v1292_v55  ;;  %v1295_v12 = vadd.f32 %v3313_v5, %v4330_v50  ;;  %2985 = vmatmul.mubr.msk.bf16.gmra.mrb[68].mxu1 %vm1517_vm2, %v1424_v32  ;;  %2994 = vmatmul.mubr.msk.bf16.gmra.mrb[84].mxu0 %vm1517_vm2, %v1424_v32 }
 0x178   : > { %1656 = vmatprep.mubr.bf16.mxu1 %v3992_v53  ;;  %1769 = vmatprep.mubr.bf16.mxu0 %v3992_v53 }
 0x179   : > { %v1392_v7 = vadd.f32 %v1391_v30, %v1295_v12  ;;  %v3314_v13 = vpop.f32.mrb[60].mxu0  ;;  %v1415_v15 = vmax.f32 %v1389_v10, 0.0 }
 0x17a   : > { %v3315_v38 = vpop.f32.mrb[61].mxu0 }
 0x17b   : > { %v1416_v16 = vmax.f32 %v1392_v7, 0.0  ;;  %v3316_v17 = vadd.f32 %v3315_v38, %v3314_v13  ;;  %v3317_v18 = vpop.f32.mrb[62].mxu0 }
 0x17c   : > { %v3318_v19 = vpop.f32.mrb[63].mxu0 }
 0x17d   : > { %v1425_v47 = vpack.c.bf16 %v1416_v16, %v1415_v15  ;;  %v1300_v20 = vadd.f32 %v3316_v17, %v4334_v4  ;;  %v3319_v50 = vadd.f32 %v3318_v19, %v3317_v18  ;;  %v1428_v4 = vlaneseq }
 0x17f   : > { %v1397_v57 = vadd.f32 %v4378_v41, %v1300_v20  ;;  %v1303_v23 = vadd.f32 %v3319_v50, %v4336_v8  ;;  %2986 = vmatmul.mubr.msk.bf16.gmra.mrb[72].mxu1 %vm1517_vm2, %v1425_v47  ;;  %2995 = vmatmul.mubr.msk.bf16.gmra.mrb[88].mxu0 %vm1517_vm2, %v1425_v47  ;;  %v4464_v8 = vshrl.u32 %v1428_v4, 7  ;;  %v4471_v41 = vld [vmem:[%s5027_s4] sm:$0x7f] }
 0x180   : > { %1666 = vmatprep.mubr.bf16.mxu1 %v3992_v53  ;;  %1779 = vmatprep.mubr.bf16.mxu0 %v3992_v53 }
 0x181   : > { %v1400_v24 = vadd.f32 %v4383_v26, %v1303_v23  ;;  %v1417_v27 = vmax.f32 %v1397_v57, 0.0  ;;  %v1442_v26 = vsub.s32 3, %v4464_v8 }
 0x183   : > { %v1418_v28 = vmax.f32 %v1400_v24, 0.0  ;;  %v4485_v33 = vrot.slane %v4471_v41, %v1442_v26 }
 0x185   : > { %v1426_v30 = vpack.c.bf16 %v1418_v28, %v1417_v27 }
 0x187   : > { %2987 = vmatmul.mubr.msk.bf16.gmra.mrb[76].mxu1 %vm1517_vm2, %v1426_v30  ;;  %2996 = vmatmul.mubr.msk.bf16.gmra.mrb[92].mxu0 %vm1517_vm2, %v1426_v30 }
 0x188   : > { %3361 = vmatprep.mubr.msk.bf16.mxu0 %vm1517_vm2, %v4346_v37  ;;  %1822 = vmatprep.mubr.bf16.mxu1 %v3992_v53 }
 0x18f   : > { %2998 = vmatmul.mubr.msk.bf16.vlgmr.msra.gmra.mrb[80].mxu1 %vm1517_vm2, %v4346_v37  ;;  %3362 = vmatmul.mubr.msk.bf16.vlgmr.msra.gmra.mrb[96].mxu0 %vm1517_vm2, %v4366_v1  ;;  %v1430_v37 = vsub.s32 0, %v4464_v8 }
 0x190   : > { %3365 = vmatprep.mubr.msk.bf16.mxu0 %vm1517_vm2, %v4380_v21  ;;  %1832 = vmatprep.mubr.bf16.mxu1 %v3992_v53 }
 0x197   : > { %2999 = vmatmul.mubr.msk.bf16.gmra.mrb[84].mxu1 %vm1517_vm2, %v4366_v1  ;;  %3366 = vmatmul.mubr.msk.bf16.gmra.mrb[100].mxu0 %vm1517_vm2, %v4392_v60  ;;  %v1438_v1 = vsub.s32 2, %v4464_v8 }
 0x198   : > { %3369 = vmatprep.mubr.msk.bf16.mxu0 %vm1517_vm2, %v4402_v25  ;;  %1842 = vmatprep.mubr.bf16.mxu1 %v3992_v53 }
 0x199   : > { %v4479_v31 = vrot.slane %v4471_v41, %v1438_v1 }
 0x19f   : > { %3000 = vmatmul.mubr.msk.bf16.gmra.mrb[88].mxu1 %vm1517_vm2, %v4380_v21  ;;  %3370 = vmatmul.mubr.msk.bf16.gmra.mrb[104].mxu0 %vm1517_vm2, %v1424_v32  ;;  %v1434_v21 = vsub.s32 1, %v4464_v8 }
 0x1a0   : > { %3373 = vmatprep.mubr.msk.bf16.mxu0 %vm1517_vm2, %v1425_v47  ;;  %1852 = vmatprep.mubr.bf16.mxu1 %v3992_v53 }
 0x1a1   : > { %v4482_v56 = vrot.slane %v4471_v41, %v1434_v21 }
 0x1a7   : > { %3001 = vmatmul.mubr.msk.bf16.gmra.mrb[92].mxu1 %vm1517_vm2, %v4392_v60  ;;  %3374 = vmatmul.mubr.msk.bf16.gmra.mrb[108].mxu0 %vm1517_vm2, %v1426_v30 }
 0x1a8   : > { %1862 = vmatprep.mubr.bf16.mxu1 %v3992_v53 }
 0x1af   : > { %3002 = vmatmul.mubr.msk.bf16.gmra.mrb[96].mxu1 %vm1517_vm2, %v4402_v25 }
 0x1b0   : > { %1872 = vmatprep.mubr.bf16.mxu1 %v3992_v53 }
 0x1b7   : > { %3003 = vmatmul.mubr.msk.bf16.gmra.mrb[100].mxu1 %vm1517_vm2, %v1424_v32 }
 0x1b8   : > { %1882 = vmatprep.mubr.bf16.mxu1 %v3992_v53 }
 0x1bf   : > { %3004 = vmatmul.mubr.msk.bf16.gmra.mrb[104].mxu1 %vm1517_vm2, %v1425_v47 }
 0x1c0   : > { %1892 = vmatprep.mubr.bf16.mxu1 %v3992_v53  ;;  %v4476_v53 = vrot.slane %v4471_v41, %v1430_v37 }
 0x1c7   : > { %3005 = vmatmul.mubr.msk.bf16.gmra.mrb[108].mxu1 %vm1517_vm2, %v1426_v30 }
 0x222   : > { %v1598_v34 = vpop.f32.mrb[48].mxu1  ;;  %v1711_v35 = vpop.f32.mrb[64].mxu0 }
 0x223   : > { %v1599_v6 = vadd.f32 %v1598_v34, %v4476_v53  ;;  %v1712_v36 = vadd.f32 %v1711_v35, %v4479_v31  ;;  %v1600_v9 = vpop.f32.mrb[49].mxu1  ;;  %v1713_v60 = vpop.f32.mrb[65].mxu0 }
 0x224   : > { %v1601_v39 = vadd.f32 %v1600_v9, %v4482_v56  ;;  %v1714_v40 = vadd.f32 %v1713_v60, %v4485_v33  ;;  %v1602_v42 = vpop.f32.mrb[50].mxu1  ;;  %v1715_v43 = vpop.f32.mrb[66].mxu0 }
 0x225   : > { %v3014_v44 = vmul.f32 -1.442695, %v1599_v6  ;;  %v3016_v45 = vmul.f32 -1.442695, %v1712_v36  ;;  %v1603_v46 = vadd.f32 %v1602_v42, %v4476_v53  ;;  %v1716_v48 = vadd.f32 %v1715_v43, %v4479_v31  ;;  %v1604_v49 = vpop.f32.mrb[51].mxu1  ;;  %v1717_v22 = vpop.f32.mrb[67].mxu0 }
 0x226   : > { %v3015_v11 = vmul.f32 -1.442695, %v1601_v39  ;;  %v3017_v51 = vmul.f32 -1.442695, %v1714_v40  ;;  %v1605_v25 = vadd.f32 %v1604_v49, %v4482_v56  ;;  %v1718_v14 = vadd.f32 %v1717_v22, %v4485_v33 }
 0x227   : > { %3535 = vpow2.f32 %v3014_v44  ;;  %v3021_v52 = vmul.f32 -1.442695, %v1603_v46  ;;  %v3023_v54 = vmul.f32 -1.442695, %v1716_v48 }
 0x228   : > { %3537 = vpow2.f32 %v3016_v45  ;;  %v3022_v58 = vmul.f32 -1.442695, %v1605_v25  ;;  %v3024_v59 = vmul.f32 -1.442695, %v1718_v14 }
 0x229   : > { %3539 = vpow2.f32 %v3015_v11 }
 0x22a   : > { %3541 = vpow2.f32 %v3017_v51  ;;  %v1608_v61 = vpop.f32.mrb[52].mxu1  ;;  %v1721_v62 = vpop.f32.mrb[68].mxu0 }
 0x22b   : > { %3543 = vpow2.f32 %v3021_v52  ;;  %v1609_v29 = vadd.f32 %v1608_v61, %v4476_v53  ;;  %v1722_v63 = vadd.f32 %v1721_v62, %v4479_v31  ;;  %v1610_v2 = vpop.f32.mrb[53].mxu1  ;;  %v1723_v0 = vpop.f32.mrb[69].mxu0 }
 0x22c   : > { %3545 = vpow2.f32 %v3023_v54  ;;  %v1611_v3 = vadd.f32 %v1610_v2, %v4482_v56  ;;  %v1724_v32 = vadd.f32 %v1723_v0, %v4485_v33  ;;  %v1612_v5 = vpop.f32.mrb[54].mxu1  ;;  %v1725_v55 = vpop.f32.mrb[70].mxu0 }
 0x22d   : > { %3547 = vpow2.f32 %v3022_v58  ;;  %v3028_v10 = vmul.f32 -1.442695, %v1609_v29  ;;  %v3030_v12 = vmul.f32 -1.442695, %v1722_v63  ;;  %v1613_v7 = vadd.f32 %v1612_v5, %v4476_v53  ;;  %v1614_v13 = vpop.f32.mrb[55].mxu1  ;;  %v1727_v38 = vpop.f32.mrb[71].mxu0 }
 0x22e   : > { %3549 = vpow2.f32 %v3024_v59  ;;  %v3029_v15 = vmul.f32 -1.442695, %v1611_v3  ;;  %v3031_v16 = vmul.f32 -1.442695, %v1724_v32  ;;  %v1726_v43 = vadd.f32 %v1725_v55, %v4479_v31 }
 0x22f   : > { %3551 = vpow2.f32 %v3028_v10  ;;  %v3035_v17 = vmul.f32 -1.442695, %v1613_v7  ;;  %v1615_v46 = vadd.f32 %v1614_v13, %v4482_v56  ;;  %v1728_v11 = vadd.f32 %v1727_v38, %v4485_v33 }
 0x230   : > { %3553 = vpow2.f32 %v3030_v12  ;;  %v3037_v29 = vmul.f32 -1.442695, %v1726_v43 }
 0x231   : > { %v3536_v18 = vpop.eup %3535  ;;  %3555 = vpow2.f32 %v3029_v15  ;;  %v3036_v5 = vmul.f32 -1.442695, %v1615_v46  ;;  %v3038_v7 = vmul.f32 -1.442695, %v1728_v11 }
 0x232   : > { %v3538_v19 = vpop.eup %3537  ;;  %v2336_v47 = vadd.f32 1.0, %v3536_v18  ;;  %3557 = vpow2.f32 %v3031_v16  ;;  %v1618_v20 = vpop.f32.mrb[56].mxu1 }
 0x233   : > { %v1731_v50 = vpop.f32.mrb[72].mxu0  ;;  %v3540_v57 = vpop.eup %3539  ;;  %v2338_v23 = vadd.f32 1.0, %v3538_v19  ;;  %3559 = vpow2.f32 %v3035_v17  ;;  %v1619_v54 = vadd.f32 %v1618_v20, %v4476_v53 }
 0x234   : > { %v1620_v24 = vpop.f32.mrb[57].mxu1  ;;  %v1733_v27 = vpop.f32.mrb[73].mxu0  ;;  %3561 = vrcp.f32 %v2336_v47  ;;  %v2337_v30 = vadd.f32 1.0, %v3540_v57  ;;  %v1732_v63 = vadd.f32 %v1731_v50, %v4479_v31 }
 0x235   : > { %v3542_v28 = vpop.eup %3541  ;;  %v1622_v4 = vpop.f32.mrb[58].mxu1  ;;  %3563 = vrcp.f32 %v2338_v23  ;;  %v1621_v55 = vadd.f32 %v1620_v24, %v4482_v56  ;;  %v1734_v13 = vadd.f32 %v1733_v27, %v4485_v33  ;;  %v3042_v15 = vmul.f32 -1.442695, %v1619_v54 }
 0x236   : > { %v4500_v37 = vpop.f32.mrb[74].mxu0  ;;  %v3544_v1 = vpop.eup %3543  ;;  %v2339_v21 = vadd.f32 1.0, %v3542_v28  ;;  %3565 = vrcp.f32 %v2337_v30  ;;  %v1623_v16 = vadd.f32 %v1622_v4, %v4476_v53  ;;  %v3044_v18 = vmul.f32 -1.442695, %v1732_v63 }
 0x237   : > { %v4502_v26 = vpop.f32.mrb[59].mxu1  ;;  %v3546_v34 = vpop.eup %3545  ;;  %v2343_v35 = vadd.f32 1.0, %v3544_v1  ;;  %v1736_v19 = vadd.f32 %v4500_v37, %v4479_v31  ;;  %v3043_v20 = vmul.f32 -1.442695, %v1621_v55  ;;  %v3045_v27 = vmul.f32 -1.442695, %v1734_v13 }
 0x238   : > { %v4504_v6 = vpop.f32.mrb[75].mxu0  ;;  %v3548_v36 = vpop.eup %3547  ;;  %3567 = vrcp.f32 %v2339_v21  ;;  %v2345_v9 = vadd.f32 1.0, %v3546_v34  ;;  %v1625_v50 = vadd.f32 %v4502_v26, %v4482_v56  ;;  %v3049_v1 = vmul.f32 -1.442695, %v1623_v16 }
 0x239   : > { %v3550_v60 = vpop.eup %3549  ;;  %3569 = vrcp.f32 %v2343_v35  ;;  %v2344_v39 = vadd.f32 1.0, %v3548_v36  ;;  %v1738_v28 = vadd.f32 %v4504_v6, %v4485_v33  ;;  %v3051_v6 = vmul.f32 -1.442695, %v1736_v19 }
 0x23a   : > { %v3552_v40 = vpop.eup %3551  ;;  %3571 = vrcp.f32 %v2345_v9  ;;  %v2346_v42 = vadd.f32 1.0, %v3550_v60  ;;  %v1628_v48 = vpop.f32.mrb[60].mxu1 }
 0x23b   : > { %v3554_v44 = vpop.eup %3553  ;;  %3573 = vrcp.f32 %v2344_v39  ;;  %v2350_v45 = vadd.f32 1.0, %v3552_v40  ;;  %v1741_v51 = vpop.f32.mrb[76].mxu0  ;;  %v1629_v21 = vadd.f32 %v1628_v48, %v4476_v53  ;;  %v3050_v40 = vmul.f32 -1.442695, %v1625_v50 }
 0x23c   : > { %v3556_v49 = vpop.eup %3555  ;;  %3575 = vrcp.f32 %v2346_v42  ;;  %v2352_v22 = vadd.f32 1.0, %v3554_v44  ;;  %v4510_v25 = vpop.f32.mrb[61].mxu1  ;;  %v1742_v36 = vadd.f32 %v1741_v51, %v4479_v31  ;;  %v3052_v43 = vmul.f32 -1.442695, %v1738_v28 }
 0x23d   : > { %v3558_v14 = vpop.eup %3557  ;;  %3577 = vrcp.f32 %v2350_v45  ;;  %v2351_v52 = vadd.f32 1.0, %v3556_v49  ;;  %v4518_v58 = vpop.f32.mrb[77].mxu0  ;;  %v3056_v46 = vmul.f32 -1.442695, %v1629_v21  ;;  %v1631_v13 = vadd.f32 %v4510_v25, %v4482_v56 }
 0x23e   : > { %v4520_v59 = vpop.f32.mrb[62].mxu1  ;;  %v3560_v61 = vpop.eup %3559  ;;  %3579 = vrcp.f32 %v2352_v22  ;;  %v2353_v62 = vadd.f32 1.0, %v3558_v14  ;;  %v3058_v49 = vmul.f32 -1.442695, %v1742_v36 }
 0x23f   : > { %v4523_v2 = vpop.f32.mrb[78].mxu0  ;;  %v4525_v0 = vpop.f32.mrb[63].mxu1  ;;  %3581 = vrcp.f32 %v2351_v52  ;;  %v2357_v32 = vadd.f32 1.0, %v3560_v61  ;;  %v1633_v36 = vadd.f32 %v4520_v59, %v4476_v53 }
 0x240   : > { %v3562_v3 = vpop.eup %3561  ;;  %v4528_v10 = vpop.f32.mrb[79].mxu0  ;;  %3583 = vrcp.f32 %v2353_v62 }
 0x241   : > { %v3564_v12 = vpop.eup %3563  ;;  %2672 = vst [vmem:[%s4515_s12] sm:$0xff] %v3562_v3  ;;  %3585 = vrcp.f32 %v2357_v32 }
 0x242   : > { %v3566_v38 = vpop.eup %3565  ;;  %2674 = vst [vmem:[%s4515_s12 + $0x10] sm:$0xff] %v3564_v12  ;;  %3587 = vpow2.f32 %v3037_v29  ;;  %v4540_v57 = vpop.f32.mrb[64].mxu1 }
 0x243   : > { %v3568_v17 = vpop.eup %3567  ;;  %2673 = vst [vmem:[%s4515_s12 + $0x8] sm:$0xff] %v3566_v38  ;;  %3589 = vpow2.f32 %v3036_v5  ;;  %v4542_v23 = vpop.f32.mrb[80].mxu0 }
 0x244   : > { %v3570_v47 = vpop.eup %3569  ;;  %2675 = vst [vmem:[%s4515_s12 + $0x18] sm:$0xff] %v3568_v17  ;;  %3591 = vpow2.f32 %v3038_v7  ;;  %v4547_v30 = vpop.f32.mrb[65].mxu1  ;;  %v1744_v17 = vadd.f32 %v4518_v58, %v4485_v33 }
 0x245   : > { %v3572_v24 = vpop.eup %3571  ;;  %2679 = vst [vmem:[%s4515_s12 + $0x38] sm:$0xff] %v3570_v47  ;;  %v4549_v4 = vpop.f32.mrb[81].mxu0  ;;  %3593 = vpow2.f32 %v3042_v15 }
 0x246   : > { %v3574_v37 = vpop.eup %3573  ;;  %2681 = vst [vmem:[%s4515_s12 + $0x48] sm:$0xff] %v3572_v24  ;;  %v4553_v26 = vpop.f32.mrb[66].mxu1  ;;  %3595 = vpow2.f32 %v3044_v18 }
 0x247   : > { %v4555_v34 = vpop.f32.mrb[82].mxu0  ;;  %v3576_v35 = vpop.eup %3575  ;;  %2680 = vst [vmem:[%s4515_s12 + $0x40] sm:$0xff] %v3574_v37  ;;  %3597 = vpow2.f32 %v3043_v20 }
 0x248   : > { %v4559_v9 = vpop.f32.mrb[67].mxu1  ;;  %v1757_v60 = vpop.f32.mrb[83].mxu0  ;;  %2682 = vst [vmem:[%s4515_s12 + $0x50] sm:$0xff] %v3576_v35  ;;  %3599 = vpow2.f32 %v3045_v27 }
 0x249   : > { %v3578_v39 = vpop.eup %3577  ;;  %v4564_v44 = vadd.f32 %v1757_v60, %v4485_v33  ;;  %3601 = vpow2.f32 %v3049_v1  ;;  %v3057_v1 = vmul.f32 -1.442695, %v1631_v13 }
 0x24a   : > { %v3580_v42 = vpop.eup %3579  ;;  %2686 = vst [vmem:[%s4515_s12 + $0x70] sm:$0xff] %v3578_v39  ;;  %3603 = vpow2.f32 %v3051_v6  ;;  %v1648_v11 = vpop.f32.mrb[68].mxu1  ;;  %v4598_v6 = vmul.f32 -1.442695, %v1744_v17 }
 0x24b   : > { %v3582_v45 = vpop.eup %3581  ;;  %2688 = vst [vmem:[%s4515_s12 + $0x80] sm:$0xff] %v3580_v42  ;;  %3605 = vpow2.f32 %v3050_v40  ;;  %v1761_v51 = vpop.f32.mrb[84].mxu0  ;;  %v4571_v52 = vadd.f32 %v1648_v11, %v4476_v53  ;;  %v1746_v42 = vadd.f32 %v4523_v2, %v4479_v31  ;;  %v1635_v2 = vadd.f32 %v4525_v0, %v4482_v56 }
 0x24c   : > { %v3584_v48 = vpop.eup %3583  ;;  %2687 = vst [vmem:[%s4515_s12 + $0x78] sm:$0xff] %v3582_v45  ;;  %3607 = vpow2.f32 %v3052_v43  ;;  %v4574_v54 = vadd.f32 %v1761_v51, %v4479_v31  ;;  %v1650_v61 = vpop.f32.mrb[69].mxu1  ;;  %v1639_v0 = vadd.f32 %v4540_v57, %v4476_v53  ;;  %v1752_v57 = vadd.f32 %v4542_v23, %v4479_v31 }
 0x24d   : > { %v3586_v22 = vpop.eup %3585  ;;  %2689 = vst [vmem:[%s4515_s12 + $0x88] sm:$0xff] %v3584_v48  ;;  %v1763_v62 = vpop.f32.mrb[85].mxu0  ;;  %3609 = vpow2.f32 %v3056_v46  ;;  %v4577_v3 = vadd.f32 %v1650_v61, %v4482_v56  ;;  %v1754_v23 = vadd.f32 %v4549_v4, %v4485_v33 }
 0x24e   : > { %v3588_v14 = vpop.eup %3587  ;;  %2693 = vst [vmem:[%s4515_s12 + $0xa8] sm:$0xff] %v3586_v22  ;;  %v4580_v32 = vadd.f32 %v1763_v62, %v4485_v33  ;;  %v1652_v5 = vpop.f32.mrb[70].mxu1  ;;  %3611 = vpow2.f32 %v3058_v49 }
 0x24f   : > { %v3590_v29 = vpop.eup %3589  ;;  %v2359_v63 = vadd.f32 1.0, %v3588_v14  ;;  %v1765_v55 = vpop.f32.mrb[86].mxu0  ;;  %v4587_v20 = vadd.f32 %v1652_v5, %v4476_v53 }
 0x250   : > { %v3592_v12 = vpop.eup %3591  ;;  %v2358_v7 = vadd.f32 1.0, %v3590_v29  ;;  %v1654_v38 = vpop.f32.mrb[71].mxu1  ;;  %v4590_v50 = vadd.f32 %v1765_v55, %v4479_v31 }
 0x251   : > { %v3594_v15 = vpop.eup %3593  ;;  %3613 = vrcp.f32 %v2359_v63  ;;  %v2360_v16 = vadd.f32 1.0, %v3592_v12  ;;  %v1767_v18 = vpop.f32.mrb[87].mxu0  ;;  %v4593_v27 = vadd.f32 %v1654_v38, %v4482_v56  ;;  %v3063_v12 = vmul.f32 -1.442695, %v1633_v36 }
 0x252   : > { %v3596_v19 = vpop.eup %3595  ;;  %3615 = vrcp.f32 %v2358_v7  ;;  %v2364_v47 = vadd.f32 1.0, %v3594_v15  ;;  %v4596_v28 = vadd.f32 %v1767_v18, %v4485_v33  ;;  %v1658_v60 = vpop.f32.mrb[72].mxu1  ;;  %v1748_v7 = vadd.f32 %v4528_v10, %v4485_v33 }
 0x253   : > { %v3598_v24 = vpop.eup %3597  ;;  %3617 = vrcp.f32 %v2360_v16  ;;  %v2366_v25 = vadd.f32 1.0, %v3596_v19  ;;  %v4605_v43 = vadd.f32 %v1658_v60, %v4476_v53  ;;  %v1771_v45 = vpop.f32.mrb[88].mxu0 }
 0x254   : > { %v3600_v58 = vpop.eup %3599  ;;  %3619 = vrcp.f32 %v2364_v47  ;;  %v2365_v37 = vadd.f32 1.0, %v3598_v24  ;;  %v1660_v46 = vpop.f32.mrb[73].mxu1  ;;  %v4608_v22 = vadd.f32 %v1771_v45, %v4479_v31  ;;  %v3065_v24 = vmul.f32 -1.442695, %v1746_v42 }
 0x255   : > { %v3602_v21 = vpop.eup %3601  ;;  %3621 = vrcp.f32 %v2366_v25  ;;  %v2367_v35 = vadd.f32 1.0, %v3600_v58  ;;  %v4611_v59 = vadd.f32 %v1660_v46, %v4482_v56  ;;  %v1773_v11 = vpop.f32.mrb[89].mxu0 }
 0x256   : > { %v3604_v39 = vpop.eup %3603  ;;  %3623 = vrcp.f32 %v2365_v37  ;;  %v2371_v40 = vadd.f32 1.0, %v3602_v21  ;;  %v1662_v51 = vpop.f32.mrb[74].mxu1  ;;  %v4616_v62 = vadd.f32 %v1773_v11, %v4485_v33  ;;  %v3064_v37 = vmul.f32 -1.442695, %v1635_v2 }
 0x257   : > { %v3606_v48 = vpop.eup %3605  ;;  %3625 = vrcp.f32 %v2367_v35  ;;  %v2373_v49 = vadd.f32 1.0, %v3604_v39  ;;  %v1775_v29 = vpop.f32.mrb[90].mxu0  ;;  %v4623_v16 = vadd.f32 %v1662_v51, %v4476_v53  ;;  %v3066_v21 = vmul.f32 -1.442695, %v1748_v7 }
 0x258   : > { %v3608_v14 = vpop.eup %3607  ;;  %3627 = vrcp.f32 %v2371_v40  ;;  %v2372_v61 = vadd.f32 1.0, %v3606_v48  ;;  %v1664_v63 = vpop.f32.mrb[75].mxu1  ;;  %v4626_v19 = vadd.f32 %v1775_v29, %v4479_v31  ;;  %v1641_v35 = vadd.f32 %v4547_v30, %v4482_v56 }
 0x259   : > { %v3610_v5 = vpop.eup %3609  ;;  %3629 = vrcp.f32 %v2373_v49  ;;  %v2374_v55 = vadd.f32 1.0, %v3608_v14  ;;  %v1777_v13 = vpop.f32.mrb[91].mxu0  ;;  %v4629_v47 = vadd.f32 %v1664_v63, %v4482_v56  ;;  %v3070_v30 = vmul.f32 -1.442695, %v1639_v0 }
 0x25a   : > { %v3612_v38 = vpop.eup %3611  ;;  %3631 = vrcp.f32 %v2372_v61  ;;  %v2378_v15 = vadd.f32 1.0, %v3610_v5  ;;  %v4635_v25 = vadd.f32 %v1777_v13, %v4485_v33  ;;  %v1668_v36 = vpop.f32.mrb[76].mxu1  ;;  %v3072_v14 = vmul.f32 -1.442695, %v1752_v57 }
 0x25b   : > { %v3614_v17 = vpop.eup %3613  ;;  %3633 = vrcp.f32 %v2374_v55  ;;  %v2380_v18 = vadd.f32 1.0, %v3612_v38  ;;  %v1781_v60 = vpop.f32.mrb[92].mxu0  ;;  %v4644_v40 = vadd.f32 %v1668_v36, %v4476_v53  ;;  %v1643_v61 = vadd.f32 %v4553_v26, %v4476_v53 }
 0x25c   : > { %v3616_v10 = vpop.eup %3615  ;;  %2695 = vst [vmem:[%s4515_s12 + $0xb8] sm:$0xff] %v3614_v17  ;;  %3635 = vrcp.f32 %v2378_v15  ;;  %v4647_v42 = vadd.f32 %v1781_v60, %v4479_v31  ;;  %v1670_v45 = vpop.f32.mrb[77].mxu1  ;;  %v3071_v5 = vmul.f32 -1.442695, %v1641_v35  ;;  %v1756_v55 = vadd.f32 %v4555_v34, %v4479_v31 }
 0x25d   : > { %v3618_v58 = vpop.eup %3617  ;;  %2694 = vst [vmem:[%s4515_s12 + $0xb0] sm:$0xff] %v3616_v10  ;;  %3637 = vrcp.f32 %v2380_v18  ;;  %v1783_v46 = vpop.f32.mrb[93].mxu0  ;;  %v4652_v49 = vadd.f32 %v1670_v45, %v4482_v56  ;;  %v3073_v34 = vmul.f32 -1.442695, %v1754_v23  ;;  %v3077_v15 = vmul.f32 -1.442695, %v1643_v61 }
 0x25e   : > { %v3620_v39 = vpop.eup %3619  ;;  %2696 = vst [vmem:[%s4515_s12 + $0xc0] sm:$0xff] %v3618_v58  ;;  %3639 = vpow2.f32 %v3057_v1  ;;  %v4655_v1 = vadd.f32 %v1783_v46, %v4485_v33  ;;  %v1672_v4 = vpop.f32.mrb[78].mxu1 }
 0x25f   : > { %v3622_v48 = vpop.eup %3621  ;;  %2700 = vst [vmem:[%s4515_s12 + $0xe0] sm:$0xff] %v3620_v39  ;;  %3641 = vpow2.f32 %v4598_v6  ;;  %v1785_v11 = vpop.f32.mrb[94].mxu0  ;;  %v4661_v2 = vadd.f32 %v1672_v4, %v4476_v53  ;;  %v1645_v53 = vadd.f32 %v4559_v9, %v4482_v56  ;;  %v3079_v9 = vmul.f32 -1.442695, %v1756_v55 }
 0x260   : > { %v3624_v51 = vpop.eup %3623  ;;  %2702 = vst [vmem:[%s4515_s12 + $0xf0] sm:$0xff] %v3622_v48  ;;  %3643 = vpow2.f32 %v3063_v12  ;;  %v1674_v6 = vpop.f32.mrb[79].mxu1  ;;  %v4667_v12 = vadd.f32 %v1785_v11, %v4479_v31 }
 0x261   : > { %v1787_v29 = vpop.f32.mrb[95].mxu0  ;;  %v3626_v63 = vpop.eup %3625  ;;  %2701 = vst [vmem:[%s4515_s12 + $0xe8] sm:$0xff] %v3624_v51  ;;  %3645 = vpow2.f32 %v3065_v24  ;;  %v4673_v26 = vadd.f32 %v1674_v6, %v4482_v56  ;;  %v3078_v18 = vmul.f32 -1.442695, %v1645_v53 }
 0x262   : > { %v3628_v7 = vpop.eup %3627  ;;  %2703 = vst [vmem:[%s4515_s12 + $0xf8] sm:$0xff] %v3626_v63  ;;  %3647 = vpow2.f32 %v3064_v37  ;;  %v4676_v13 = vadd.f32 %v1787_v29, %v4485_v33  ;;  %v4681_v56 = vpop.f32.mrb[80].mxu1 }
 0x263   : > { %v3630_v38 = vpop.eup %3629  ;;  %2707 = vst [vmem:[%s4515_s12 + $0x118] sm:$0xff] %v3628_v7  ;;  %3649 = vpow2.f32 %v3066_v21  ;;  %v4683_v17 = vpop.f32.mrb[96].mxu0 }
 0x264   : > { %v3632_v31 = vpop.eup %3631  ;;  %2709 = vst [vmem:[%s4515_s12 + $0x128] sm:$0xff] %v3630_v38  ;;  %3651 = vpow2.f32 %v3070_v30  ;;  %v4686_v10 = vpop.f32.mrb[81].mxu1 }
 0x265   : > { %v3634_v0 = vpop.eup %3633  ;;  %2708 = vst [vmem:[%s4515_s12 + $0x120] sm:$0xff] %v3632_v31  ;;  %3653 = vpow2.f32 %v3072_v14  ;;  %v4688_v24 = vpop.f32.mrb[97].mxu0 }
 0x266   : > { %v3636_v33 = vpop.eup %3635  ;;  %2710 = vst [vmem:[%s4515_s12 + $0x130] sm:$0xff] %v3634_v0  ;;  %3655 = vpow2.f32 %v3071_v5  ;;  %v4691_v58 = vpop.f32.mrb[82].mxu1 }
 0x267   : > { %v3638_v57 = vpop.eup %3637  ;;  %2714 = vst [vmem:[%s4515_s12 + $0x150] sm:$0xff] %v3636_v33  ;;  %3657 = vpow2.f32 %v3073_v34  ;;  %v4693_v37 = vpop.f32.mrb[98].mxu0 }
 0x268   : > { %v3640_v21 = vpop.eup %3639  ;;  %2716 = vst [vmem:[%s4515_s12 + $0x160] sm:$0xff] %v3638_v57  ;;  %3659 = vpow2.f32 %v3077_v15  ;;  %v4696_v35 = vpop.f32.mrb[83].mxu1 }
 0x269   : > { %v4698_v36 = vpop.f32.mrb[99].mxu0  ;;  %v3642_v60 = vpop.eup %3641  ;;  %v2379_v39 = vadd.f32 1.0, %v3640_v21  ;;  %3661 = vpow2.f32 %v3079_v9 }
 0x26a   : > { %v3644_v23 = vpop.eup %3643  ;;  %v2381_v45 = vadd.f32 1.0, %v3642_v60  ;;  %3663 = vpow2.f32 %v3078_v18  ;;  %v4700_v14 = vpop.f32.mrb[84].mxu1 }
 0x26b   : > { %v3646_v46 = vpop.eup %3645  ;;  %3665 = vrcp.f32 %v2379_v39  ;;  %v2385_v48 = vadd.f32 1.0, %v3644_v23  ;;  %v4702_v29 = vpop.f32.mrb[100].mxu0 }
 0x26c   : > { %v3648_v30 = vpop.eup %3647  ;;  %3667 = vrcp.f32 %v2381_v45  ;;  %v2387_v4 = vadd.f32 1.0, %v3646_v46  ;;  %v4704_v63 = vpop.f32.mrb[85].mxu1  ;;  %v3080_v45 = vmul.f32 -1.442695, %v4564_v44  ;;  %v3085_v44 = vmul.f32 -1.442695, %v4577_v3 }
 0x26d   : > { %v3650_v11 = vpop.eup %3649  ;;  %3669 = vrcp.f32 %v2385_v48  ;;  %v2386_v51 = vadd.f32 1.0, %v3648_v30  ;;  %v4706_v7 = vpop.f32.mrb[101].mxu0  ;;  %v3084_v30 = vmul.f32 -1.442695, %v4571_v52  ;;  %v3091_v3 = vmul.f32 -1.442695, %v4587_v20 }
 0x26e   : > { %v3652_v61 = vpop.eup %3651  ;;  %3671 = vrcp.f32 %v2387_v4  ;;  %v2388_v6 = vadd.f32 1.0, %v3650_v11  ;;  %v4708_v53 = vpop.f32.mrb[86].mxu1  ;;  %v3094_v20 = vmul.f32 -1.442695, %v4596_v28 }
 0x26f   : > { %v3654_v5 = vpop.eup %3653  ;;  %3673 = vrcp.f32 %v2386_v51  ;;  %v2392_v55 = vadd.f32 1.0, %v3652_v61  ;;  %v4710_v31 = vpop.f32.mrb[102].mxu0  ;;  %v3086_v51 = vmul.f32 -1.442695, %v4574_v54  ;;  %v3087_v54 = vmul.f32 -1.442695, %v4580_v32 }
 0x270   : > { %v3656_v38 = vpop.eup %3655  ;;  %3675 = vrcp.f32 %v2388_v6  ;;  %v2394_v34 = vadd.f32 1.0, %v3654_v5  ;;  %v4712_v15 = vpop.f32.mrb[87].mxu1  ;;  %v1446_v32 = vsub.s32 4, %v4464_v8 }
 0x271   : > { %v3658_v0 = vpop.eup %3657  ;;  %3677 = vrcp.f32 %v2392_v55  ;;  %v2393_v9 = vadd.f32 1.0, %v3656_v38  ;;  %v4714_v33 = vpop.f32.mrb[103].mxu0 }
 0x272   : > { %v3660_v18 = vpop.eup %3659  ;;  %3679 = vrcp.f32 %v2394_v34  ;;  %v2395_v57 = vadd.f32 1.0, %v3658_v0  ;;  %v4718_v4 = vpop.f32.mrb[88].mxu1 }
 0x273   : > { %v3662_v21 = vpop.eup %3661  ;;  %3681 = vrcp.f32 %v2393_v9  ;;  %v2399_v60 = vadd.f32 1.0, %v3660_v18  ;;  %v4722_v61 = vpop.f32.mrb[104].mxu0 }
 0x274   : > { %v3664_v39 = vpop.eup %3663  ;;  %3683 = vrcp.f32 %v2395_v57  ;;  %v2401_v23 = vadd.f32 1.0, %v3662_v21  ;;  %v4724_v6 = vpop.f32.mrb[89].mxu1  ;;  %v3093_v21 = vmul.f32 -1.442695, %v4590_v50 }
 0x275   : > { %v3666_v46 = vpop.eup %3665  ;;  %3685 = vrcp.f32 %v2399_v60  ;;  %v2400_v48 = vadd.f32 1.0, %v3664_v39  ;;  %v4728_v55 = vpop.f32.mrb[105].mxu0  ;;  %v3092_v39 = vmul.f32 -1.442695, %v4593_v27  ;;  %v3100_v27 = vmul.f32 -1.442695, %v4608_v22 }
 0x276   : > { %v3668_v11 = vpop.eup %3667  ;;  %2715 = vst [vmem:[%s4515_s12 + $0x158] sm:$0xff] %v3666_v46  ;;  %3687 = vrcp.f32 %v2401_v23  ;;  %v4730_v52 = vpop.f32.mrb[90].mxu1  ;;  %v3098_v46 = vmul.f32 -1.442695, %v4605_v43  ;;  %v3099_v43 = vmul.f32 -1.442695, %v4611_v59 }
 0x277   : > { %v3670_v5 = vpop.eup %3669  ;;  %2717 = vst [vmem:[%s4515_s12 + $0x168] sm:$0xff] %v3668_v11  ;;  %3689 = vrcp.f32 %v2400_v48  ;;  %v4734_v34 = vpop.f32.mrb[106].mxu0  ;;  %v4758_v11 = vrot.slane %v4471_v41, %v1446_v32  ;;  %v3101_v41 = vmul.f32 -1.442695, %v4616_v62 }
 0x278   : > { %v3672_v38 = vpop.eup %3671  ;;  %2721 = vst [vmem:[%s4515_s12 + $0x188] sm:$0xff] %v3670_v5  ;;  %3691 = vpow2.f32 %v3080_v45  ;;  %v4736_v0 = vpop.f32.mrb[91].mxu1 }
 0x279   : > { %v3674_v9 = vpop.eup %3673  ;;  %2723 = vst [vmem:[%s4515_s12 + $0x198] sm:$0xff] %v3672_v38  ;;  %3693 = vpow2.f32 %v3084_v30  ;;  %v4740_v18 = vpop.f32.mrb[107].mxu0 }
 0x27a   : > { %v3676_v57 = vpop.eup %3675  ;;  %2722 = vst [vmem:[%s4515_s12 + $0x190] sm:$0xff] %v3674_v9  ;;  %3695 = vpow2.f32 %v3086_v51  ;;  %v4751_v50 = vpop.f32.mrb[92].mxu1 }
 0x27b   : > { %v3678_v60 = vpop.eup %3677  ;;  %2724 = vst [vmem:[%s4515_s12 + $0x1a0] sm:$0xff] %v3676_v57  ;;  %3697 = vpow2.f32 %v3085_v44  ;;  %v4753_v48 = vpop.f32.mrb[108].mxu0 }
 0x27c   : > { %v3680_v23 = vpop.eup %3679  ;;  %2728 = vst [vmem:[%s4515_s12 + $0x1c0] sm:$0xff] %v3678_v60  ;;  %3699 = vpow2.f32 %v3087_v54  ;;  %v4760_v51 = vpop.f32.mrb[93].mxu1 }
 0x27d   : > { %v3682_v45 = vpop.eup %3681  ;;  %2730 = vst [vmem:[%s4515_s12 + $0x1d0] sm:$0xff] %v3680_v23  ;;  %3701 = vpow2.f32 %v3091_v3  ;;  %v4762_v28 = vpop.f32.mrb[109].mxu0 }
 0x27e   : > { %v3684_v30 = vpop.eup %3683  ;;  %2729 = vst [vmem:[%s4515_s12 + $0x1c8] sm:$0xff] %v3682_v45  ;;  %3703 = vpow2.f32 %v3093_v21  ;;  %v1858_v44 = vpop.f32.mrb[94].mxu1 }
 0x27f   : > { %v3686_v5 = vpop.eup %3685  ;;  %2731 = vst [vmem:[%s4515_s12 + $0x1d8] sm:$0xff] %v3684_v30  ;;  %3705 = vpow2.f32 %v3092_v39  ;;  %v4766_v38 = vpop.f32.mrb[110].mxu0  ;;  %v4771_v22 = vadd.f32 %v1858_v44, %v4758_v11 }
 0x280   : > { %v3688_v54 = vpop.eup %3687  ;;  %2735 = vst [vmem:[%s4515_s12 + $0x1f8] sm:$0xff] %v3686_v5  ;;  %3707 = vpow2.f32 %v3094_v20  ;;  %v4773_v9 = vpop.f32.mrb[95].mxu1 }
 0x281   : > { %v4775_v3 = vpop.f32.mrb[111].mxu0  ;;  %v3690_v57 = vpop.eup %3689  ;;  %2737 = vst [vmem:[%s4515_s12 + $0x208] sm:$0xff] %v3688_v54  ;;  %3709 = vpow2.f32 %v3098_v46 }
 0x282   : > { %v3692_v21 = vpop.eup %3691  ;;  %2736 = vst [vmem:[%s4515_s12 + $0x200] sm:$0xff] %v3690_v57  ;;  %3711 = vpow2.f32 %v3100_v27  ;;  %v1864_v20 = vpop.f32.mrb[96].mxu1 }
 0x283   : > { %v3694_v59 = vpop.eup %3693  ;;  %v2402_v32 = vadd.f32 1.0, %v3692_v21  ;;  %3713 = vpow2.f32 %v3099_v43  ;;  %v4780_v5 = vadd.f32 %v1864_v20, %v4758_v11  ;;  %v4782_v46 = vpop.f32.mrb[97].mxu1 }
 0x284   : > { %v3696_v60 = vpop.eup %3695  ;;  %v2406_v39 = vadd.f32 1.0, %v3694_v59  ;;  %3715 = vpow2.f32 %v3101_v41  ;;  %v1868_v54 = vpop.f32.mrb[98].mxu1 }
 0x285   : > { %v3698_v62 = vpop.eup %3697  ;;  %3717 = vrcp.f32 %v2402_v32  ;;  %v2408_v23 = vadd.f32 1.0, %v3696_v60  ;;  %5029 = vst [vmem:[#allocation2_spill] sm:$0xff] %v4780_v5  ;;  %v4785_v41 = vadd.f32 %v1868_v54, %v4758_v11  ;;  %v4787_v21 = vpop.f32.mrb[99].mxu1 }
 0x286   : > { %v3700_v45 = vpop.eup %3699  ;;  %3719 = vrcp.f32 %v2406_v39  ;;  %v2407_v30 = vadd.f32 1.0, %v3698_v62 }
 0x287   : > { %v3702_v44 = vpop.eup %3701  ;;  %3721 = vrcp.f32 %v2408_v23  ;;  %v2409_v27 = vadd.f32 1.0, %v3700_v45  ;;  %5030 = vst [vmem:[#allocation3_spill] sm:$0xff] %v4785_v41  ;;  %v1450_v23 = vsub.s32 5, %v4464_v8 }
 0x288   : > { %v3704_v43 = vpop.eup %3703  ;;  %3723 = vrcp.f32 %v2407_v30  ;;  %v2413_v57 = vadd.f32 1.0, %v3702_v44 }
 0x289   : > { %v3706_v59 = vpop.eup %3705  ;;  %3725 = vrcp.f32 %v2409_v27  ;;  %v2415_v32 = vadd.f32 1.0, %v3704_v43  ;;  %v3105_v43 = vmul.f32 -1.442695, %v4623_v16 }
 0x28a   : > { %v3708_v60 = vpop.eup %3707  ;;  %3727 = vrcp.f32 %v2413_v57  ;;  %v2414_v39 = vadd.f32 1.0, %v3706_v59  ;;  %v1874_v41 = vpop.f32.mrb[100].mxu1 }
 0x28b   : > { %v3710_v62 = vpop.eup %3709  ;;  %3729 = vrcp.f32 %v2415_v32  ;;  %v2416_v20 = vadd.f32 1.0, %v3708_v60  ;;  %v4792_v57 = vadd.f32 %v1874_v41, %v4758_v11  ;;  %v4794_v59 = vpop.f32.mrb[101].mxu1 }
 0x28c   : > { %v3712_v45 = vpop.eup %3711  ;;  %3731 = vrcp.f32 %v2414_v39  ;;  %v2420_v30 = vadd.f32 1.0, %v3710_v62  ;;  %v3107_v39 = vmul.f32 -1.442695, %v4626_v19  ;;  %v4800_v62 = vld [vmem:[%s5027_s4] sm:$0x7f]  ;;  %v1878_v16 = vpop.f32.mrb[102].mxu1 }
 0x28d   : > { %v3714_v44 = vpop.eup %3713  ;;  %3733 = vrcp.f32 %v2416_v20  ;;  %v2422_v54 = vadd.f32 1.0, %v3712_v45  ;;  %v4803_v20 = vrot.slane %v4800_v62, %v1450_v23  ;;  %v3106_v45 = vmul.f32 -1.442695, %v4629_v47  ;;  %v1880_v19 = vpop.f32.mrb[103].mxu1 }
 0x28e   : > { %v3716_v5 = vpop.eup %3715  ;;  %3735 = vrcp.f32 %v2420_v30  ;;  %v2421_v27 = vadd.f32 1.0, %v3714_v44  ;;  %v3108_v44 = vmul.f32 -1.442695, %v4635_v25  ;;  %v3112_v47 = vmul.f32 -1.442695, %v4644_v40 }
 0x28f   : > { %v3718_v32 = vpop.eup %3717  ;;  %3737 = vrcp.f32 %v2422_v54  ;;  %v2423_v60 = vadd.f32 1.0, %v3716_v5  ;;  %v4808_v5 = vadd.f32 %v1878_v16, %v4758_v11  ;;  %v4813_v23 = vadd.f32 %v1880_v19, %v4803_v20 }
 0x290   : > { %v3720_v41 = vpop.eup %3719  ;;  %2738 = vst [vmem:[%s4515_s12 + $0x210] sm:$0xff] %v3718_v32  ;;  %3739 = vrcp.f32 %v2421_v27  ;;  %v3114_v32 = vmul.f32 -1.442695, %v4647_v42  ;;  %v3113_v25 = vmul.f32 -1.442695, %v4652_v49  ;;  %v1825_v42 = vadd.f32 %v4681_v56, %v4758_v11 }
 0x291   : > { %v3722_v30 = vpop.eup %3721  ;;  %2742 = vst [vmem:[%s4515_s12 + $0x230] sm:$0xff] %v3720_v41  ;;  %3741 = vrcp.f32 %v2423_v60  ;;  %v3115_v41 = vmul.f32 -1.442695, %v4655_v1  ;;  %v3119_v40 = vmul.f32 -1.442695, %v4661_v2 }
 0x292   : > { %v3724_v54 = vpop.eup %3723  ;;  %2744 = vst [vmem:[%s4515_s12 + $0x240] sm:$0xff] %v3722_v30  ;;  %3743 = vpow2.f32 %v3105_v43  ;;  %v1884_v43 = vpop.f32.mrb[104].mxu1  ;;  %v3121_v1 = vmul.f32 -1.442695, %v4667_v12  ;;  %v3120_v2 = vmul.f32 -1.442695, %v4673_v26 }
 0x293   : > { %v3726_v27 = vpop.eup %3725  ;;  %2743 = vst [vmem:[%s4515_s12 + $0x238] sm:$0xff] %v3724_v54  ;;  %3745 = vpow2.f32 %v3107_v39  ;;  %v4828_v39 = vadd.f32 %v1884_v43, %v4758_v11  ;;  %v1886_v49 = vpop.f32.mrb[105].mxu1  ;;  %v3122_v12 = vmul.f32 -1.442695, %v4676_v13  ;;  %v1454_v43 = vsub.s32 6, %v4464_v8 }
 0x294   : > { %v3728_v16 = vpop.eup %3727  ;;  %2745 = vst [vmem:[%s4515_s12 + $0x248] sm:$0xff] %v3726_v27  ;;  %3747 = vpow2.f32 %v3106_v45  ;;  %v4833_v30 = vadd.f32 %v1886_v49, %v4803_v20 }
 0x295   : > { %v3730_v60 = vpop.eup %3729  ;;  %2749 = vst [vmem:[%s4515_s12 + $0x268] sm:$0xff] %v3728_v16  ;;  %3749 = vpow2.f32 %v3108_v44  ;;  %v1888_v44 = vpop.f32.mrb[106].mxu1 }
 0x296   : > { %v3732_v19 = vpop.eup %3731  ;;  %2751 = vst [vmem:[%s4515_s12 + $0x278] sm:$0xff] %v3730_v60  ;;  %3751 = vpow2.f32 %v3112_v47  ;;  %v4838_v56 = vadd.f32 %v1888_v44, %v4758_v11  ;;  %v1890_v47 = vpop.f32.mrb[107].mxu1  ;;  %v3018_v60 = vmul.f32 -1.442695, %v1825_v42 }
 0x297   : > { %v3734_v45 = vpop.eup %3733  ;;  %2750 = vst [vmem:[%s4515_s12 + $0x270] sm:$0xff] %v3732_v19  ;;  %3753 = vpow2.f32 %v3114_v32  ;;  %v4843_v32 = vadd.f32 %v1890_v47, %v4803_v20 }
 0x298   : > { %v3736_v54 = vpop.eup %3735  ;;  %2752 = vst [vmem:[%s4515_s12 + $0x280] sm:$0xff] %v3734_v45  ;;  %3755 = vpow2.f32 %v3113_v25 }
 0x299   : > { %v3738_v27 = vpop.eup %3737  ;;  %2756 = vst [vmem:[%s4515_s12 + $0x2a0] sm:$0xff] %v3736_v54  ;;  %3757 = vpow2.f32 %v3115_v41 }
 0x29a   : > { %v3740_v16 = vpop.eup %3739  ;;  %2758 = vst [vmem:[%s4515_s12 + $0x2b0] sm:$0xff] %v3738_v27  ;;  %3759 = vpow2.f32 %v3119_v40  ;;  %v1894_v41 = vpop.f32.mrb[108].mxu1  ;;  %v4856_v27 = vrot.slane %v4800_v62, %v1454_v43 }
 0x29b   : > { %v3742_v25 = vpop.eup %3741  ;;  %2757 = vst [vmem:[%s4515_s12 + $0x2a8] sm:$0xff] %v3740_v16  ;;  %3761 = vpow2.f32 %v3121_v1  ;;  %v4850_v44 = vadd.f32 %v1894_v41, %v4758_v11  ;;  %v1896_v40 = vpop.f32.mrb[109].mxu1 }
 0x29c   : > { %v3744_v26 = vpop.eup %3743  ;;  %2759 = vst [vmem:[%s4515_s12 + $0x2b8] sm:$0xff] %v3742_v25  ;;  %3763 = vpow2.f32 %v3120_v2  ;;  %v4853_v1 = vadd.f32 %v1896_v40, %v4803_v20  ;;  %v1898_v2 = vpop.f32.mrb[110].mxu1  ;;  %v1946_v43 = vadd.f32 %v4683_v17, %v4856_v27 }
 0x29d   : > { %v3746_v19 = vpop.eup %3745  ;;  %v2427_v49 = vadd.f32 1.0, %v3744_v26  ;;  %3765 = vpow2.f32 %v3122_v12  ;;  %v4859_v12 = vadd.f32 %v1898_v2, %v4758_v11  ;;  %v1900_v16 = vpop.f32.mrb[111].mxu1 }
 0x29e   : > { %v3748_v13 = vpop.eup %3747  ;;  %v2429_v45 = vadd.f32 1.0, %v3746_v19  ;;  %3767 = vpow2.f32 %v3018_v60  ;;  %v4862_v26 = vadd.f32 %v1900_v16, %v4803_v20 }
 0x29f   : > { %v3750_v42 = vpop.eup %3749  ;;  %3769 = vrcp.f32 %v2427_v49  ;;  %v2428_v54 = vadd.f32 1.0, %v3748_v13 }
 0x2a0   : > { %v3752_v47 = vpop.eup %3751  ;;  %3771 = vrcp.f32 %v2429_v45  ;;  %v2430_v8 = vadd.f32 1.0, %v3750_v42 }
 0x2a1   : > { %v3754_v60 = vpop.eup %3753  ;;  %3773 = vrcp.f32 %v2428_v54  ;;  %v2434_v25 = vadd.f32 1.0, %v3752_v47  ;;  %v1827_v54 = vadd.f32 %v4686_v10, %v4803_v20  ;;  %v1949_v10 = vadd.f32 %v4693_v37, %v4856_v27 }
 0x2a2   : > { %v3756_v19 = vpop.eup %3755  ;;  %3775 = vrcp.f32 %v2430_v8  ;;  %v2436_v49 = vadd.f32 1.0, %v3754_v60  ;;  %v1938_v8 = vadd.f32 %v4688_v24, %v4856_v27 }
 0x2a3   : > { %v3758_v41 = vpop.eup %3757  ;;  %3777 = vrcp.f32 %v2434_v25  ;;  %v2435_v13 = vadd.f32 1.0, %v3756_v19  ;;  %v1829_v25 = vadd.f32 %v4691_v58, %v4758_v11  ;;  %v3019_v24 = vmul.f32 -1.442695, %v1827_v54 }
 0x2a4   : > { %v3760_v45 = vpop.eup %3759  ;;  %3779 = vrcp.f32 %v2436_v49  ;;  %v2437_v62 = vadd.f32 1.0, %v3758_v41  ;;  %v3034_v49 = vmul.f32 -1.442695, %v1946_v43  ;;  %v3020_v58 = vmul.f32 -1.442695, %v1938_v8 }
 0x2a5   : > { %v3762_v40 = vpop.eup %3761  ;;  %3781 = vrcp.f32 %v2435_v13  ;;  %v2441_v42 = vadd.f32 1.0, %v3760_v45  ;;  %v1831_v45 = vadd.f32 %v4696_v35, %v4803_v20  ;;  %v3025_v37 = vmul.f32 -1.442695, %v1829_v25 }
 0x2a6   : > { %v3764_v2 = vpop.eup %3763  ;;  %3783 = vrcp.f32 %v2437_v62  ;;  %v2443_v47 = vadd.f32 1.0, %v3762_v40  ;;  %v1941_v40 = vadd.f32 %v4698_v36, %v4856_v27  ;;  %v3041_v35 = vmul.f32 -1.442695, %v1949_v10 }
 0x2a7   : > { %v3766_v16 = vpop.eup %3765  ;;  %3785 = vrcp.f32 %v2441_v42  ;;  %v2442_v60 = vadd.f32 1.0, %v3764_v2  ;;  %v1835_v42 = vadd.f32 %v4700_v14, %v4758_v11  ;;  %v1962_v2 = vadd.f32 %v4702_v29, %v4856_v27 }
 0x2a8   : > { %v3768_v17 = vpop.eup %3767  ;;  %3787 = vrcp.f32 %v2443_v47  ;;  %v2444_v19 = vadd.f32 1.0, %v3766_v16  ;;  %v3026_v36 = vmul.f32 -1.442695, %v1831_v45  ;;  %v1837_v8 = vadd.f32 %v4704_v63, %v4803_v20 }
 0x2a9   : > { %v3770_v41 = vpop.eup %3769  ;;  %3789 = vrcp.f32 %v2442_v60  ;;  %v2340_v13 = vadd.f32 1.0, %v3768_v17  ;;  %v3027_v14 = vmul.f32 -1.442695, %v1941_v40  ;;  %v1954_v60 = vadd.f32 %v4706_v7, %v4856_v27 }
 0x2aa   : > { %v3772_v62 = vpop.eup %3771  ;;  %2763 = vst [vmem:[%s4515_s12 + $0x2d8] sm:$0xff] %v3770_v41  ;;  %3791 = vrcp.f32 %v2444_v19  ;;  %v3032_v29 = vmul.f32 -1.442695, %v1835_v42  ;;  %v1839_v17 = vadd.f32 %v4708_v53, %v4758_v11  ;;  %v3062_v63 = vmul.f32 -1.442695, %v1962_v2 }
 0x2ab   : > { %v3774_v43 = vpop.eup %3773  ;;  %2765 = vst [vmem:[%s4515_s12 + $0x2e8] sm:$0xff] %v3772_v62  ;;  %3793 = vrcp.f32 %v2340_v13  ;;  %v3033_v7 = vmul.f32 -1.442695, %v1837_v8  ;;  %v3048_v13 = vmul.f32 -1.442695, %v1954_v60 }
 0x2ac   : > { %v3776_v54 = vpop.eup %3775  ;;  %2764 = vst [vmem:[%s4515_s12 + $0x2e0] sm:$0xff] %v3774_v43  ;;  %3795 = vpow2.f32 %v3034_v49  ;;  %v1965_v49 = vadd.f32 %v4710_v31, %v4856_v27  ;;  %v3039_v53 = vmul.f32 -1.442695, %v1839_v17 }
 0x2ad   : > { %v3778_v47 = vpop.eup %3777  ;;  %2766 = vst [vmem:[%s4515_s12 + $0x2f0] sm:$0xff] %v3776_v54  ;;  %3797 = vpow2.f32 %v3019_v24 }
 0x2ae   : > { %v3780_v16 = vpop.eup %3779  ;;  %2770 = vst [vmem:[%s4515_s12 + $0x310] sm:$0xff] %v3778_v47  ;;  %3799 = vpow2.f32 %v3020_v58  ;;  %v3069_v62 = vmul.f32 -1.442695, %v1965_v49 }
 0x2af   : > { %v3782_v25 = vpop.eup %3781  ;;  %2772 = vst [vmem:[%s4515_s12 + $0x320] sm:$0xff] %v3780_v16  ;;  %3801 = vpow2.f32 %v3025_v37 }
 0x2b0   : > { %v3784_v19 = vpop.eup %3783  ;;  %2771 = vst [vmem:[%s4515_s12 + $0x318] sm:$0xff] %v3782_v25  ;;  %3803 = vpow2.f32 %v3041_v35 }
 0x2b1   : > { %v3786_v10 = vpop.eup %3785  ;;  %2773 = vst [vmem:[%s4515_s12 + $0x328] sm:$0xff] %v3784_v19  ;;  %3805 = vpow2.f32 %v3026_v36  ;;  %v1841_v19 = vadd.f32 %v4712_v15, %v4803_v20 }
 0x2b2   : > { %v3788_v41 = vpop.eup %3787  ;;  %2777 = vst [vmem:[%s4515_s12 + $0x348] sm:$0xff] %v3786_v10  ;;  %3807 = vpow2.f32 %v3027_v14  ;;  %v1957_v10 = vadd.f32 %v4714_v33, %v4856_v27  ;;  %v1847_v33 = vadd.f32 %v4724_v6, %v4803_v20 }
 0x2b3   : > { %v3790_v24 = vpop.eup %3789  ;;  %2779 = vst [vmem:[%s4515_s12 + $0x358] sm:$0xff] %v3788_v41  ;;  %3809 = vpow2.f32 %v3032_v29 }
 0x2b4   : > { %v3792_v45 = vpop.eup %3791  ;;  %2778 = vst [vmem:[%s4515_s12 + $0x350] sm:$0xff] %v3790_v24  ;;  %3811 = vpow2.f32 %v3062_v63 }
 0x2b5   : > { %v3794_v58 = vpop.eup %3793  ;;  %2780 = vst [vmem:[%s4515_s12 + $0x360] sm:$0xff] %v3792_v45  ;;  %3813 = vpow2.f32 %v3033_v7  ;;  %v1978_v45 = vadd.f32 %v4722_v61, %v4856_v27 }
 0x2b6   : > { %v3796_v31 = vpop.eup %3795  ;;  %2676 = vst [vmem:[%s4515_s12 + $0x20] sm:$0xff] %v3794_v58  ;;  %3815 = vpow2.f32 %v3048_v13  ;;  %v1845_v13 = vadd.f32 %v4718_v4, %v4758_v11  ;;  %v3040_v58 = vmul.f32 -1.442695, %v1841_v19  ;;  %v3055_v4 = vmul.f32 -1.442695, %v1957_v10 }
 0x2b7   : > { %v3798_v40 = vpop.eup %3797  ;;  %v2356_v43 = vadd.f32 1.0, %v3796_v31  ;;  %3817 = vpow2.f32 %v3039_v53  ;;  %v3090_v6 = vmul.f32 -1.442695, %v1978_v45 }
 0x2b8   : > { %v3800_v37 = vpop.eup %3799  ;;  %v2341_v42 = vadd.f32 1.0, %v3798_v40  ;;  %3819 = vpow2.f32 %v3069_v62  ;;  %v3046_v61 = vmul.f32 -1.442695, %v1845_v13 }
 0x2b9   : > { %v3802_v54 = vpop.eup %3801  ;;  %3821 = vrcp.f32 %v2356_v43  ;;  %v2342_v35 = vadd.f32 1.0, %v3800_v37  ;;  %v1970_v43 = vadd.f32 %v4728_v55, %v4856_v27  ;;  %v3047_v55 = vmul.f32 -1.442695, %v1847_v33 }
 0x2ba   : > { %v3804_v2 = vpop.eup %3803  ;;  %3823 = vrcp.f32 %v2341_v42  ;;  %v2347_v47 = vadd.f32 1.0, %v3802_v54  ;;  %v1849_v42 = vadd.f32 %v4730_v52, %v4758_v11 }
 0x2bb   : > { %v3806_v36 = vpop.eup %3805  ;;  %3825 = vrcp.f32 %v2342_v35  ;;  %v2363_v8 = vadd.f32 1.0, %v3804_v2  ;;  %v1981_v35 = vadd.f32 %v4734_v34, %v4856_v27  ;;  %v3076_v52 = vmul.f32 -1.442695, %v1970_v43 }
 0x2bc   : > { %v3808_v16 = vpop.eup %3807  ;;  %3827 = vrcp.f32 %v2347_v47  ;;  %v2348_v14 = vadd.f32 1.0, %v3806_v36  ;;  %v1851_v47 = vadd.f32 %v4736_v0, %v4803_v20  ;;  %v3053_v34 = vmul.f32 -1.442695, %v1849_v42 }
 0x2bd   : > { %v3810_v60 = vpop.eup %3809  ;;  %3829 = vrcp.f32 %v2363_v8  ;;  %v2349_v25 = vadd.f32 1.0, %v3808_v16  ;;  %v1973_v8 = vadd.f32 %v4740_v18, %v4856_v27  ;;  %v3097_v0 = vmul.f32 -1.442695, %v1981_v35 }
 0x2be   : > { %v3812_v29 = vpop.eup %3811  ;;  %3831 = vrcp.f32 %v2348_v14  ;;  %v2354_v17 = vadd.f32 1.0, %v3810_v60  ;;  %v1855_v14 = vadd.f32 %v4751_v50, %v4758_v11  ;;  %v3054_v18 = vmul.f32 -1.442695, %v1851_v47 }
 0x2bf   : > { %v3814_v63 = vpop.eup %3813  ;;  %3833 = vrcp.f32 %v2349_v25  ;;  %v2384_v49 = vadd.f32 1.0, %v3812_v29  ;;  %v1994_v25 = vadd.f32 %v4753_v48, %v4856_v27  ;;  %v3083_v50 = vmul.f32 -1.442695, %v1973_v8 }
 0x2c0   : > { %v3816_v7 = vpop.eup %3815  ;;  %3835 = vrcp.f32 %v2354_v17  ;;  %v2355_v41 = vadd.f32 1.0, %v3814_v63  ;;  %v1857_v17 = vadd.f32 %v4760_v51, %v4803_v20  ;;  %v3060_v48 = vmul.f32 -1.442695, %v1855_v14 }
 0x2c1   : > { %v3818_v24 = vpop.eup %3817  ;;  %3837 = vrcp.f32 %v2384_v49  ;;  %v2370_v53 = vadd.f32 1.0, %v3816_v7  ;;  %v3118_v49 = vmul.f32 -1.442695, %v1994_v25 }
 0x2c2   : > { %v3820_v15 = vpop.eup %3819  ;;  %3839 = vrcp.f32 %v2355_v41  ;;  %v2361_v62 = vadd.f32 1.0, %v3818_v24  ;;  %v3061_v51 = vmul.f32 -1.442695, %v1857_v17 }
 0x2c3   : > { %v3822_v31 = vpop.eup %3821  ;;  %3841 = vrcp.f32 %v2370_v53  ;;  %v2391_v40 = vadd.f32 1.0, %v3820_v15 }
 0x2c4   : > { %v3824_v37 = vpop.eup %3823  ;;  %2692 = vst.msk [vmem:[%s4515_s12 + $0xa0] sm:$0xff] %vm990_vm0, %v3822_v31  ;;  %3843 = vrcp.f32 %v2361_v62 }
 0x2c5   : > { %v3826_v54 = vpop.eup %3825  ;;  %2677 = vst [vmem:[%s4515_s12 + $0x28] sm:$0xff] %v3824_v37  ;;  %3845 = vrcp.f32 %v2391_v40 }
 0x2c6   : > { %v3828_v2 = vpop.eup %3827  ;;  %2678 = vst.msk [vmem:[%s4515_s12 + $0x30] sm:$0xff] %vm990_vm0, %v3826_v54  ;;  %3847 = vpow2.f32 %v3040_v58 }
 0x2c7   : > { %v3830_v36 = vpop.eup %3829  ;;  %2683 = vst [vmem:[%s4515_s12 + $0x58] sm:$0xff] %v3828_v2  ;;  %3849 = vpow2.f32 %v3055_v4 }
 0x2c8   : > { %v3832_v16 = vpop.eup %3831  ;;  %2699 = vst.msk [vmem:[%s4515_s12 + $0xd8] sm:$0xff] %vm990_vm0, %v3830_v36  ;;  %3851 = vpow2.f32 %v3046_v61  ;;  %v1997_v36 = vadd.f32 %v4766_v38, %v4856_v27  ;;  %v3067_v38 = vmul.f32 -1.442695, %v4771_v22  ;;  %v1871_v22 = vadd.f32 %v4787_v21, %v4803_v20  ;;  %v5032_v21 = vld [vmem:[#allocation3_spill] sm:$0xff] }
 0x2c9   : > { %v3834_v60 = vpop.eup %3833  ;;  %2684 = vst [vmem:[%s4515_s12 + $0x60] sm:$0xff] %v3832_v16  ;;  %3853 = vpow2.f32 %v3090_v6  ;;  %v1986_v6 = vadd.f32 %v4762_v28, %v4856_v27  ;;  %v1861_v16 = vadd.f32 %v4773_v9, %v4803_v20  ;;  %v1867_v9 = vadd.f32 %v4782_v46, %v4803_v20 }
 0x2ca   : > { %v3836_v29 = vpop.eup %3835  ;;  %2685 = vst.msk [vmem:[%s4515_s12 + $0x68] sm:$0xff] %vm990_vm0, %v3834_v60  ;;  %3855 = vpow2.f32 %v3047_v55  ;;  %v1989_v60 = vadd.f32 %v4775_v3, %v4856_v27 }
 0x2cb   : > { %v3838_v19 = vpop.eup %3837  ;;  %2690 = vst [vmem:[%s4515_s12 + $0x90] sm:$0xff] %v3836_v29  ;;  %3857 = vpow2.f32 %v3076_v52  ;;  %v3104_v14 = vmul.f32 -1.442695, %v1986_v6 }
 0x2cc   : > { %v3840_v11 = vpop.eup %3839  ;;  %2720 = vst.msk [vmem:[%s4515_s12 + $0x180] sm:$0xff] %vm990_vm0, %v3838_v19  ;;  %3859 = vpow2.f32 %v3053_v34  ;;  %v3068_v19 = vmul.f32 -1.442695, %v1861_v16  ;;  %v3111_v27 = vmul.f32 -1.442695, %v1989_v60 }
 0x2cd   : > { %v3842_v63 = vpop.eup %3841  ;;  %2691 = vst [vmem:[%s4515_s12 + $0x98] sm:$0xff] %v3840_v11  ;;  %3861 = vpow2.f32 %v3097_v0  ;;  %v5031_v11 = vld [vmem:[#allocation2_spill] sm:$0xff] }
 0x2ce   : > { %v3844_v10 = vpop.eup %3843  ;;  %2706 = vst.msk [vmem:[%s4515_s12 + $0x110] sm:$0xff] %vm990_vm0, %v3842_v63  ;;  %3863 = vpow2.f32 %v3054_v18  ;;  %v3125_v18 = vmul.f32 -1.442695, %v1997_v36  ;;  %v3074_v46 = vmul.f32 -1.442695, %v5031_v11 }
 0x2cf   : > { %v3846_v7 = vpop.eup %3845  ;;  %2697 = vst [vmem:[%s4515_s12 + $0xc8] sm:$0xff] %v3844_v10  ;;  %3865 = vpow2.f32 %v3083_v50  ;;  %v3075_v63 = vmul.f32 -1.442695, %v1867_v9  ;;  %v3109_v9 = vmul.f32 -1.442695, %v4838_v56 }
 0x2d0   : > { %v3848_v41 = vpop.eup %3847  ;;  %2727 = vst.msk [vmem:[%s4515_s12 + $0x1b8] sm:$0xff] %vm990_vm0, %v3846_v7  ;;  %3867 = vpow2.f32 %v3060_v48 }
 0x2d1   : > { %v3850_v13 = vpop.eup %3849  ;;  %v2362_v24 = vadd.f32 1.0, %v3848_v41  ;;  %3869 = vpow2.f32 %v3118_v49  ;;  %v1877_v49 = vadd.f32 %v4794_v59, %v4803_v20  ;;  %v3082_v41 = vmul.f32 -1.442695, %v1871_v22 }
 0x2d2   : > { %v3852_v53 = vpop.eup %3851  ;;  %v2377_v45 = vadd.f32 1.0, %v3850_v13  ;;  %3871 = vpow2.f32 %v3061_v51  ;;  %v3081_v51 = vmul.f32 -1.442695, %v5032_v21 }
 0x2d3   : > { %v3854_v15 = vpop.eup %3853  ;;  %3873 = vrcp.f32 %v2362_v24  ;;  %v2368_v62 = vadd.f32 1.0, %v3852_v53  ;;  %v3088_v24 = vmul.f32 -1.442695, %v4792_v57  ;;  %v3089_v20 = vmul.f32 -1.442695, %v1877_v49 }
 0x2d4   : > { %v3856_v58 = vpop.eup %3855  ;;  %3875 = vrcp.f32 %v2377_v45  ;;  %v2412_v33 = vadd.f32 1.0, %v3854_v15  ;;  %v3095_v45 = vmul.f32 -1.442695, %v4808_v5 }
 0x2d5   : > { %v3858_v31 = vpop.eup %3857  ;;  %3877 = vrcp.f32 %v2368_v62  ;;  %v2369_v40 = vadd.f32 1.0, %v3856_v58  ;;  %v3096_v62 = vmul.f32 -1.442695, %v4813_v23 }
 0x2d6   : > { %v3860_v4 = vpop.eup %3859  ;;  %3879 = vrcp.f32 %v2412_v33  ;;  %v2398_v43 = vadd.f32 1.0, %v3858_v31 }
 0x2d7   : > { %v3862_v37 = vpop.eup %3861  ;;  %3881 = vrcp.f32 %v2369_v40  ;;  %v2375_v61 = vadd.f32 1.0, %v3860_v4 }
 0x2d8   : > { %v3864_v42 = vpop.eup %3863  ;;  %3883 = vrcp.f32 %v2398_v43  ;;  %v2419_v54 = vadd.f32 1.0, %v3862_v37 }
 0x2d9   : > { %v3866_v35 = vpop.eup %3865  ;;  %3885 = vrcp.f32 %v2375_v61  ;;  %v2376_v2 = vadd.f32 1.0, %v3864_v42 }
 0x2da   : > { %v3868_v55 = vpop.eup %3867  ;;  %3887 = vrcp.f32 %v2419_v54  ;;  %v2405_v47 = vadd.f32 1.0, %v3866_v35 }
 0x2db   : > { %v3870_v52 = vpop.eup %3869  ;;  %3889 = vrcp.f32 %v2376_v2  ;;  %v2382_v8 = vadd.f32 1.0, %v3868_v55 }
 0x2dc   : > { %v3872_v34 = vpop.eup %3871  ;;  %3891 = vrcp.f32 %v2405_v47  ;;  %v2440_v28 = vadd.f32 1.0, %v3870_v52 }
 0x2dd   : > { %v3874_v0 = vpop.eup %3873  ;;  %3893 = vrcp.f32 %v2382_v8  ;;  %v2383_v25 = vadd.f32 1.0, %v3872_v34 }
 0x2de   : > { %v3876_v29 = vpop.eup %3875  ;;  %2698 = vst [vmem:[%s4515_s12 + $0xd0] sm:$0xff] %v3874_v0  ;;  %3895 = vrcp.f32 %v2440_v28  ;;  %v3102_v0 = vmul.f32 -1.442695, %v4828_v39 }
 0x2df   : > { %v3878_v17 = vpop.eup %3877  ;;  %2713 = vst.msk [vmem:[%s4515_s12 + $0x148] sm:$0xff] %vm990_vm0, %v3876_v29  ;;  %3897 = vrcp.f32 %v2383_v25  ;;  %v3103_v29 = vmul.f32 -1.442695, %v4833_v30  ;;  %v3116_v30 = vmul.f32 -1.442695, %v4850_v44 }
 0x2e0   : > { %v3880_v3 = vpop.eup %3879  ;;  %2704 = vst [vmem:[%s4515_s12 + $0x100] sm:$0xff] %v3878_v17  ;;  %3899 = vpow2.f32 %v3104_v14  ;;  %v3124_v44 = vmul.f32 -1.442695, %v4862_v26 }
 0x2e1   : > { %v3882_v50 = vpop.eup %3881  ;;  %2748 = vst.msk [vmem:[%s4515_s12 + $0x260] sm:$0xff] %vm990_vm0, %v3880_v3  ;;  %3901 = vpow2.f32 %v3067_v38 }
 0x2e2   : > { %v3884_v48 = vpop.eup %3883  ;;  %2705 = vst [vmem:[%s4515_s12 + $0x108] sm:$0xff] %v3882_v50  ;;  %3903 = vpow2.f32 %v3125_v18 }
 0x2e3   : > { %v3886_v10 = vpop.eup %3885  ;;  %2734 = vst.msk [vmem:[%s4515_s12 + $0x1f0] sm:$0xff] %vm990_vm0, %v3884_v48  ;;  %3905 = vpow2.f32 %v3068_v19  ;;  %v3110_v19 = vmul.f32 -1.442695, %v4843_v32  ;;  %v3123_v32 = vmul.f32 -1.442695, %v4859_v12 }
 0x2e4   : > { %v3888_v7 = vpop.eup %3887  ;;  %2711 = vst [vmem:[%s4515_s12 + $0x138] sm:$0xff] %v3886_v10  ;;  %3907 = vpow2.f32 %v3111_v27  ;;  %v3117_v27 = vmul.f32 -1.442695, %v4853_v1 }
 0x2e5   : > { %v3890_v13 = vpop.eup %3889  ;;  %2755 = vst.msk [vmem:[%s4515_s12 + $0x298] sm:$0xff] %vm990_vm0, %v3888_v7  ;;  %3909 = vpow2.f32 %v3074_v46 }
 0x2e6   : > { %v3892_v59 = vpop.eup %3891  ;;  %2712 = vst [vmem:[%s4515_s12 + $0x140] sm:$0xff] %v3890_v13  ;;  %3911 = vpow2.f32 %v3075_v63 }
 0x2e7   : > { %v3894_v53 = vpop.eup %3893  ;;  %2741 = vst.msk [vmem:[%s4515_s12 + $0x228] sm:$0xff] %vm990_vm0, %v3892_v59  ;;  %3913 = vpow2.f32 %v3081_v51 }
 0x2e8   : > { %v3896_v15 = vpop.eup %3895  ;;  %2718 = vst [vmem:[%s4515_s12 + $0x170] sm:$0xff] %v3894_v53  ;;  %3915 = vpow2.f32 %v3082_v41 }
 0x2e9   : > { %v3898_v58 = vpop.eup %3897  ;;  %2776 = vst.msk [vmem:[%s4515_s12 + $0x340] sm:$0xff] %vm990_vm0, %v3896_v15  ;;  %3917 = vpow2.f32 %v3088_v24 }
 0x2ea   : > { %v3900_v57 = vpop.eup %3899  ;;  %2719 = vst [vmem:[%s4515_s12 + $0x178] sm:$0xff] %v3898_v58  ;;  %3919 = vpow2.f32 %v3089_v20 }
 0x2eb   : > { %v3902_v33 = vpop.eup %3901  ;;  %v2426_v31 = vadd.f32 1.0, %v3900_v57  ;;  %3921 = vpow2.f32 %v3095_v45 }
 0x2ec   : > { %v3904_v40 = vpop.eup %3903  ;;  %v2389_v4 = vadd.f32 1.0, %v3902_v33  ;;  %3923 = vpow2.f32 %v3096_v62 }
 0x2ed   : > { %v3906_v43 = vpop.eup %3905  ;;  %3925 = vrcp.f32 %v2426_v31  ;;  %v2447_v5 = vadd.f32 1.0, %v3904_v40 }
 0x2ee   : > { %v3908_v37 = vpop.eup %3907  ;;  %3927 = vrcp.f32 %v2389_v4  ;;  %v2390_v61 = vadd.f32 1.0, %v3906_v43 }
 0x2ef   : > { %v3910_v23 = vpop.eup %3909  ;;  %3929 = vrcp.f32 %v2447_v5  ;;  %v2433_v42 = vadd.f32 1.0, %v3908_v37 }
 0x2f0   : > { %v3912_v54 = vpop.eup %3911  ;;  %3931 = vrcp.f32 %v2390_v61  ;;  %v2396_v6 = vadd.f32 1.0, %v3910_v23 }
 0x2f1   : > { %v3914_v35 = vpop.eup %3913  ;;  %3933 = vrcp.f32 %v2433_v42  ;;  %v2397_v2 = vadd.f32 1.0, %v3912_v54 }
 0x2f2   : > { %v3916_v55 = vpop.eup %3915  ;;  %3935 = vrcp.f32 %v2396_v6  ;;  %v2403_v47 = vadd.f32 1.0, %v3914_v35 }
 0x2f3   : > { %v3918_v36 = vpop.eup %3917  ;;  %3937 = vrcp.f32 %v2397_v2  ;;  %v2404_v52 = vadd.f32 1.0, %v3916_v55 }
 0x2f4   : > { %v3920_v8 = vpop.eup %3919  ;;  %3939 = vrcp.f32 %v2403_v47  ;;  %v2410_v16 = vadd.f32 1.0, %v3918_v36 }
 0x2f5   : > { %v3922_v34 = vpop.eup %3921  ;;  %3941 = vrcp.f32 %v2404_v52  ;;  %v2411_v28 = vadd.f32 1.0, %v3920_v8 }
 0x2f6   : > { %v3924_v14 = vpop.eup %3923  ;;  %3943 = vrcp.f32 %v2410_v16  ;;  %v2417_v60 = vadd.f32 1.0, %v3922_v34 }
 0x2f7   : > { %v3926_v25 = vpop.eup %3925  ;;  %3945 = vrcp.f32 %v2411_v28  ;;  %v2418_v38 = vadd.f32 1.0, %v3924_v14 }
 0x2f8   : > { %v3928_v18 = vpop.eup %3927  ;;  %2762 = vst.msk [vmem:[%s4515_s12 + $0x2d0] sm:$0xff] %vm990_vm0, %v3926_v25  ;;  %3947 = vrcp.f32 %v2417_v60 }
 0x2f9   : > { %v3930_v17 = vpop.eup %3929  ;;  %2725 = vst [vmem:[%s4515_s12 + $0x1a8] sm:$0xff] %v3928_v18  ;;  %3949 = vrcp.f32 %v2418_v38 }
 0x2fa   : > { %v3932_v39 = vpop.eup %3931  ;;  %2783 = vst.msk [vmem:[%s4515_s12 + $0x378] sm:$0xff] %vm990_vm0, %v3930_v17  ;;  %3951 = vpow2.f32 %v3102_v0 }
 0x2fb   : > { %v3934_v3 = vpop.eup %3933  ;;  %2726 = vst [vmem:[%s4515_s12 + $0x1b0] sm:$0xff] %v3932_v39  ;;  %3953 = vpow2.f32 %v3103_v29 }
 0x2fc   : > { %v3936_v56 = vpop.eup %3935  ;;  %2769 = vst.msk [vmem:[%s4515_s12 + $0x308] sm:$0xff] %vm990_vm0, %v3934_v3  ;;  %3955 = vpow2.f32 %v3109_v9 }
 0x2fd   : > { %v3938_v22 = vpop.eup %3937  ;;  %2732 = vst [vmem:[%s4515_s12 + $0x1e0] sm:$0xff] %v3936_v56  ;;  %3957 = vpow2.f32 %v3110_v19 }
 0x2fe   : > { %v3940_v50 = vpop.eup %3939  ;;  %2733 = vst [vmem:[%s4515_s12 + $0x1e8] sm:$0xff] %v3938_v22  ;;  %3959 = vpow2.f32 %v3116_v30 }
 0x2ff   : > { %v3942_v1 = vpop.eup %3941  ;;  %2739 = vst [vmem:[%s4515_s12 + $0x218] sm:$0xff] %v3940_v50  ;;  %3961 = vpow2.f32 %v3117_v27 }
 0x300   : > { %v3944_v11 = vpop.eup %3943  ;;  %2740 = vst [vmem:[%s4515_s12 + $0x220] sm:$0xff] %v3942_v1  ;;  %3963 = vpow2.f32 %v3123_v32 }
 0x301   : > { %v3946_v46 = vpop.eup %3945  ;;  %2746 = vst [vmem:[%s4515_s12 + $0x250] sm:$0xff] %v3944_v11  ;;  %3965 = vpow2.f32 %v3124_v44 }
 0x302   : > { %v3948_v12 = vpop.eup %3947  ;;  %2747 = vst [vmem:[%s4515_s12 + $0x258] sm:$0xff] %v3946_v46 }
 0x303   : > { %v3950_v48 = vpop.eup %3949  ;;  %2753 = vst [vmem:[%s4515_s12 + $0x288] sm:$0xff] %v3948_v12 }
 0x304   : > { %v3952_v63 = vpop.eup %3951  ;;  %2754 = vst [vmem:[%s4515_s12 + $0x290] sm:$0xff] %v3950_v48 }
 0x305   : > { %v3954_v26 = vpop.eup %3953  ;;  %v2424_v49 = vadd.f32 1.0, %v3952_v63 }
 0x306   : > { %v3956_v10 = vpop.eup %3955  ;;  %v2425_v21 = vadd.f32 1.0, %v3954_v26 }
 0x307   : > { %v3958_v51 = vpop.eup %3957  ;;  %3967 = vrcp.f32 %v2424_v49  ;;  %v2431_v7 = vadd.f32 1.0, %v3956_v10 }
 0x308   : > { %v3960_v41 = vpop.eup %3959  ;;  %3969 = vrcp.f32 %v2425_v21  ;;  %v2432_v13 = vadd.f32 1.0, %v3958_v51 }
 0x309   : > { %v3962_v24 = vpop.eup %3961  ;;  %3971 = vrcp.f32 %v2431_v7  ;;  %v2438_v59 = vadd.f32 1.0, %v3960_v41 }
 0x30a   : > { %v3964_v20 = vpop.eup %3963  ;;  %3973 = vrcp.f32 %v2432_v13  ;;  %v2439_v53 = vadd.f32 1.0, %v3962_v24 }
 0x30b   : > { %v3966_v45 = vpop.eup %3965  ;;  %3975 = vrcp.f32 %v2438_v59  ;;  %v2445_v15 = vadd.f32 1.0, %v3964_v20 }
 0x30c   : > { %3977 = vrcp.f32 %v2439_v53  ;;  %v2446_v62 = vadd.f32 1.0, %v3966_v45 }
 0x30d   : > { %3979 = vrcp.f32 %v2445_v15 }
 0x30e   : > { %3981 = vrcp.f32 %v2446_v62 }
 0x311   : > { %v3968_v58 = vpop.eup %3967 }
 0x312   : > { %v3970_v57 = vpop.eup %3969  ;;  %2760 = vst [vmem:[%s4515_s12 + $0x2c0] sm:$0xff] %v3968_v58 }
 0x313   : > { %v3972_v33 = vpop.eup %3971  ;;  %2761 = vst [vmem:[%s4515_s12 + $0x2c8] sm:$0xff] %v3970_v57 }
 0x314   : > { %v3974_v31 = vpop.eup %3973  ;;  %2767 = vst [vmem:[%s4515_s12 + $0x2f8] sm:$0xff] %v3972_v33 }
 0x315   : > { %v3976_v40 = vpop.eup %3975  ;;  %2768 = vst [vmem:[%s4515_s12 + $0x300] sm:$0xff] %v3974_v31 }
 0x316   : > { %v3978_v4 = vpop.eup %3977  ;;  %2774 = vst [vmem:[%s4515_s12 + $0x330] sm:$0xff] %v3976_v40 }
 0x317   : > { %v3980_v43 = vpop.eup %3979  ;;  %2775 = vst [vmem:[%s4515_s12 + $0x338] sm:$0xff] %v3978_v4 }
 0x318   : > { %v3982_v5 = vpop.eup %3981  ;;  %2781 = vst [vmem:[%s4515_s12 + $0x368] sm:$0xff] %v3980_v43 }
 0x319   : > { %2782 = vst [vmem:[%s4515_s12 + $0x370] sm:$0xff] %v3982_v5 }
 0x31a PF: > { %s15_s18 = sadd.s32 1, %s3990_s18  }
 0x31b   : > { %p12_p4 = scmp.ge.s32.totalorder %s15_s18, 4  }
 0x31d   :  { %14 = sbr.rel (!%p12_p4) target bundleno = 1 (0x1), region = 70 }

</bundles_post_ra>
